<compile_context>
chip_gen: v5e
topology: v5e:2x2
jax: 0.10.0
libtpu: 0.0.40
codegen_flags: <defaults>
</compile_context>

<pallas_src>
import functools

import jax
import jax.numpy as jnp
from jax.experimental import pallas as pl
from jax.experimental.pallas import tpu as pltpu

# ---- small, CLIP-ViT-shaped synthetic config (lane-dense hidden dim) ----
IMG_SIZE = 16               # stands in for 224
PATCH = 4                   # stands in for 14
GRID = IMG_SIZE // PATCH    # 4
NUM_PATCHES = GRID * GRID   # 16
SEQ = NUM_PATCHES + 1       # class token + patches = 17 (num_positions)
S_PAD = 24                  # SEQ padded up to a multiple of 8 (sublane aligned)
HIDDEN = 128                # vision_embed_dim stand-in; 128 lanes => dense vst
HEADS = 2
HEAD_DIM = HIDDEN // HEADS  # 64 (same head_dim as real CLIP-ViT-L)
MLP = 4 * HIDDEN            # 512
LAYERS = 2
PATCH_DIM = 3 * PATCH * PATCH  # 48
EPS = 1e-5
ATTN_SCALE = HEAD_DIM ** -0.5

# packed per-layer vector slab: rows, width = MLP (>= 3*HIDDEN and >= MLP)
VEC_W = MLP
(R_LN1G, R_LN1B, R_QKVB, R_OB, R_LN2G, R_LN2B, R_F1B, R_F2B) = range(8)

CLIP_MEAN = (0.48145466, 0.4578275, 0.40821073)
CLIP_STD = (0.26862954, 0.26130258, 0.27577711)


# ------------------------------ helpers -------------------------------------

def _ln(x, g, b):
    """Row-wise LayerNorm over the last axis; g/b shaped (1, D)."""
    mean = jnp.mean(x, axis=-1, keepdims=True)
    c = x - mean
    var = jnp.mean(c * c, axis=-1, keepdims=True)
    return c * jax.lax.rsqrt(var + EPS) * g + b


# ------- kernel 1: patch embed (+ folded preprocessing) + cls/pos + pre-LN ---

def _embed_kernel(p_ref, w_ref, bias_ref, cp_ref, g_ref, b_ref, o_ref):
    # p_ref rows are laid out exactly like the output: per batch element,
    # row 0 (cls) and rows SEQ..S_PAD-1 (pad) are zero rows, rows 1..SEQ-1 are
    # the flattened patches.  One big matmul feeds the whole batch at once.
    pe = jnp.dot(p_ref[...], w_ref[...], preferred_element_type=jnp.float32)
    rows = p_ref.shape[0]
    r = jax.lax.broadcasted_iota(jnp.int32, (rows, 1), 0) % S_PAD
    is_patch = jnp.logical_and(r >= 1, r < SEQ)
    # folded preprocessing bias applies only to real patch rows
    x = jnp.where(is_patch, pe + bias_ref[...], 0.0) + cp_ref[...]
    x = _ln(x, g_ref[...], b_ref[...])
    # zero padded rows, then a SINGLE aligned full-block store
    o_ref[...] = jnp.where(r < SEQ, x, 0.0)


def embed_tokens(patches_padded, patch_w, patch_b, cls_pos_tiled, pre_g, pre_b):
    rows = patches_padded.shape[0]          # B * S_PAD
    return pl.pallas_call(
        _embed_kernel,
        out_shape=jax.ShapeDtypeStruct((rows, HIDDEN), jnp.float32),
        grid=(1,),
        in_specs=[
            pl.BlockSpec((rows, PATCH_DIM), lambda i: (0, 0)),
            pl.BlockSpec((PATCH_DIM, HIDDEN), lambda i: (0, 0)),
            pl.BlockSpec((1, HIDDEN), lambda i: (0, 0)),
            pl.BlockSpec((rows, HIDDEN), lambda i: (0, 0)),
            pl.BlockSpec((1, HIDDEN), lambda i: (0, 0)),
            pl.BlockSpec((1, HIDDEN), lambda i: (0, 0)),
        ],
        out_specs=pl.BlockSpec((rows, HIDDEN), lambda i: (0, 0)),
    )(patches_padded, patch_w, patch_b, cls_pos_tiled, pre_g, pre_b)


# ----------------- kernel 2: fused transformer encoder ----------------------

def _encoder_kernel(x0_ref, vec_ref, qkvw_ref, ow_ref, f1w_ref, f2w_ref,
                    o_ref, *, batch_per_block):
    layer = pl.program_id(1)

    # Load the pre-LN'd tokens into the RESIDENT output block at layer 0.
    # out_spec's index is constant along the layer axis, so o_ref stays in VMEM
    # across layers and is written back to HBM only once at the end.
    @pl.when(layer == 0)
    def _():
        o_ref[...] = x0_ref[...]

    x = o_ref[...]                                  # (BB*S_PAD, D) resident

    vec = vec_ref[0]                                # (8, VEC_W) packed vectors
    ln1_g = vec[R_LN1G:R_LN1G + 1, 0:HIDDEN]
    ln1_b = vec[R_LN1B:R_LN1B + 1, 0:HIDDEN]
    qkv_b = vec[R_QKVB:R_QKVB + 1, 0:3 * HIDDEN]
    o_b = vec[R_OB:R_OB + 1, 0:HIDDEN]
    ln2_g = vec[R_LN2G:R_LN2G + 1, 0:HIDDEN]
    ln2_b = vec[R_LN2B:R_LN2B + 1, 0:HIDDEN]
    f1_b = vec[R_F1B:R_F1B + 1, 0:MLP]
    f2_b = vec[R_F2B:R_F2B + 1, 0:HIDDEN]

    # ---- self-attention block (pre-LN, fused QKV matmul) ----
    h = _ln(x, ln1_g, ln1_b)
    qkv = jnp.dot(h, qkvw_ref[0],
                  preferred_element_type=jnp.float32) + qkv_b
    q = qkv[:, 0:HIDDEN] * ATTN_SCALE
    k = qkv[:, HIDDEN:2 * HIDDEN]
    v = qkv[:, 2 * HIDDEN:3 * HIDDEN]
    ow = ow_ref[0]

    # Mask padded KEY positions (SEQ..S_PAD-1).  NOTE: padded rows accumulate
    # nonzero values across layers (LN beta, attention over real keys), but
    # they can never leak into real rows because padded keys are masked here
    # and the padded query rows are sliced off after the encoder.
    kmask = jax.lax.broadcasted_iota(jnp.int32, (1, S_PAD), 1) < SEQ

    proj_blocks = []
    for b in range(batch_per_block):                # static, tiny
        r0 = b * S_PAD
        qb = q[r0:r0 + S_PAD, :]
        vb = v[r0:r0 + S_PAD, :]
        kbT = k[r0:r0 + S_PAD, :].T                 # ONE transpose per batch elem
        acc = None
        for hh in range(HEADS):
            c0 = hh * HEAD_DIM
            s = jnp.dot(qb[:, c0:c0 + HEAD_DIM], kbT[c0:c0 + HEAD_DIM, :],
                        preferred_element_type=jnp.float32)   # (S_PAD, S_PAD)
            s = jnp.where(kmask, s, -1e30)
            s = s - jnp.max(s, axis=-1, keepdims=True)
            p = jnp.exp(s)
            p = p * pl.reciprocal(jnp.sum(p, axis=-1, keepdims=True),
                                  approx=True)
            ho = jnp.dot(p, vb[:, c0:c0 + HEAD_DIM],
                         preferred_element_type=jnp.float32)  # (S_PAD, HEAD_DIM)
            # fold the head concat into the output projection: rows c0..c0+HD
            hp = jnp.dot(ho, ow[c0:c0 + HEAD_DIM, :],
                         preferred_element_type=jnp.float32)  # (S_PAD, D)
            acc = hp if acc is None else acc + hp
        proj_blocks.append(acc)
    attn_proj = (proj_blocks[0] if batch_per_block == 1
                 else jnp.concatenate(proj_blocks, axis=0))

    x = attn_proj + o_b + x

    # ---- MLP block (quick_gelu) ----
    h = _ln(x, ln2_g, ln2_b)
    h = jnp.dot(h, f1w_ref[0], preferred_element_type=jnp.float32) + f1_b
    h = h * jax.nn.sigmoid(1.702 * h)               # quick_gelu
    x = jnp.dot(h, f2w_ref[0], preferred_element_type=jnp.float32) + f2_b + x

    o_ref[...] = x                                  # VMEM-resident update


def transformer_encoder(x0, layer_params, batch):
    # Split the batch across (at most) 2 parallel grid blocks so a v7x megacore
    # can use both TensorCores; on v5e/v6e the parallel axis is just a loop.
    nbb = 2 if (batch >= 2 and batch % 2 == 0) else 1
    bpb = batch // nbb
    m_blk = bpb * S_PAD
    lp = layer_params

    def wspec(shape):
        return pl.BlockSpec((1,) + shape, lambda p, l: (l,) + (0,) * len(shape))

    act_spec = pl.BlockSpec((m_blk, HIDDEN), lambda p, l: (p, 0))

    return pl.pallas_call(
        functools.partial(_encoder_kernel, batch_per_block=bpb),
        out_shape=jax.ShapeDtypeStruct((batch * S_PAD, HIDDEN), jnp.float32),
        grid=(nbb, LAYERS),
        in_specs=[
            act_spec,                              # x0 (pre-LN'd tokens)
            wspec((8, VEC_W)),                     # packed per-layer vectors
            wspec((HIDDEN, 3 * HIDDEN)),           # fused qkv_w
            wspec((HIDDEN, HIDDEN)),               # o_w
            wspec((HIDDEN, MLP)),                  # fc1_w
            wspec((MLP, HIDDEN)),                  # fc2_w
        ],
        out_specs=act_spec,
        compiler_params=pltpu.CompilerParams(
            dimension_semantics=("parallel", "arbitrary"),
            # Toy sizes fit trivially.  At real CLIP dims (D>=1024) also cast
            # the stacked per-layer weights to bf16 so the double-buffered
            # weight blocks fit v7x's 64 MiB VMEM / default scoped limits.
            vmem_limit_bytes=32 * 1024 * 1024),
    )(x0, lp["vecs"], lp["qkv_w"], lp["o_w"], lp["fc1_w"], lp["fc2_w"])


# ------------------------- synthetic parameter init -------------------------

def init_params(key):
    keys = jax.random.split(key, 3 + LAYERS)

    def normal(k, shape):
        return 0.02 * jax.random.normal(k, shape, jnp.float32)

    params = {
        # conv2d(3, D, kernel=PATCH, stride=PATCH, bias=False) flattened (C*Kh*Kw, D)
        "patch_w": normal(keys[0], (PATCH_DIM, HIDDEN)),
        "class_emb": normal(keys[1], (HIDDEN,)),
        "pos_emb": normal(keys[2], (SEQ, HIDDEN)),
        "pre_ln_g": jnp.ones((1, HIDDEN), jnp.float32),
        "pre_ln_b": jnp.zeros((1, HIDDEN), jnp.float32),
    }

    qkv_w, o_w, f1_w, f2_w, vecs = [], [], [], [], []
    for li in range(LAYERS):
        lk = jax.random.split(keys[3 + li], 10)
        qw = normal(lk[0], (HIDDEN, HIDDEN))
        kw = normal(lk[1], (HIDDEN, HIDDEN))
        vw = normal(lk[2], (HIDDEN, HIDDEN))
        qkv_w.append(jnp.concatenate([qw, kw, vw], axis=1))
        o_w.append(normal(lk[3], (HIDDEN, HIDDEN)))
        f1_w.append(normal(lk[4], (HIDDEN, MLP)))
        f2_w.append(normal(lk[5], (MLP, HIDDEN)))
        # packed per-layer vector slab (8, VEC_W): gains/biases, lane-padded
        vec = jnp.zeros((8, VEC_W), jnp.float32)
        vec = vec.at[R_LN1G, :HIDDEN].set(1.0)
        vec = vec.at[R_LN1B, :HIDDEN].set(normal(lk[6], (HIDDEN,)))
        vec = vec.at[R_QKVB, :3 * HIDDEN].set(normal(lk[7], (3 * HIDDEN,)))
        vec = vec.at[R_OB, :HIDDEN].set(normal(lk[8], (HIDDEN,)))
        vec = vec.at[R_LN2G, :HIDDEN].set(1.0)
        vec = vec.at[R_F1B, :MLP].set(normal(lk[9], (MLP,)))
        vecs.append(vec)

    params["layers"] = {
        "qkv_w": jnp.stack(qkv_w), "o_w": jnp.stack(o_w),
        "fc1_w": jnp.stack(f1_w), "fc2_w": jnp.stack(f2_w),
        "vecs": jnp.stack(vecs),
    }
    return params


# ------------------------------ forward pass --------------------------------

def clip_image_grid_embed(image, params, value_range=(-1.0, 1.0)):
    """Forward pass of FrozenCLIPImageGridEmbedder (zero_embedding_radio=0)."""
    B, C, H, W = image.shape
    assert C == 3
    image = image.astype(jnp.float32)

    # Resize(shorter side -> IMG_SIZE, bilinear, antialias) + CenterCrop (XLA glue).
    # TODO(synk): antialiased bilinear resize has no clean Pallas equivalent; kept in XLA.
    short = min(H, W)
    new_h = int(round(H * IMG_SIZE / short))
    new_w = int(round(W * IMG_SIZE / short))
    image = jax.image.resize(image, (B, 3, new_h, new_w), method="bilinear",
                             antialias=True)
    top = (new_h - IMG_SIZE) // 2
    left = (new_w - IMG_SIZE) // 2
    image = image[:, :, top:top + IMG_SIZE, left:left + IMG_SIZE]

    # Fold the per-channel preprocessing affine into the patch-embed weights.
    # Value-range rescale and CLIP Normalize are per-channel affines; they
    # commute with antialiased bilinear resize (weights sum to 1 per output
    # pixel), and the stride-PATCH conv is linear per channel, so scaling W
    # per channel and adding a bias row (shift-weighted column sums of W) is
    # EXACT -- no separate preprocessing kernel / extra image HBM round trip.
    low, high = value_range
    s1 = 1.0 / (high - low)
    t1 = -low / (high - low)
    mean = jnp.asarray(CLIP_MEAN, jnp.float32)
    std = jnp.asarray(CLIP_STD, jnp.float32)
    scale_c = s1 / std                                  # (3,)
    shift_c = (t1 - mean) / std                         # (3,)
    pp = PATCH * PATCH
    w = params["patch_w"]
    patch_w_folded = w * jnp.repeat(scale_c, pp)[:, None]
    patch_bias = jnp.sum(w * jnp.repeat(shift_c, pp)[:, None],
                         axis=0, keepdims=True)         # (1, D)

    # im2col glue: same (C, ph, pw) flattening order as the conv weight, with
    # patch rows pre-placed at output offsets (zero cls row + zero tail rows per
    # batch element) so the embed kernel's store is one aligned full block.
    # TODO(synk): could fold this into the embed kernel's DMA via a (b, patch-row)
    # grid index_map to avoid the XLA transpose round-trip at real 224^2 scale.
    patches = image.reshape(B, 3, GRID, PATCH, GRID, PATCH)
    patches = patches.transpose(0, 2, 4, 1, 3, 5).reshape(B, NUM_PATCHES, PATCH_DIM)
    patches = jnp.pad(patches, ((0, 0), (1, S_PAD - SEQ), (0, 0)))
    patches = patches.reshape(B * S_PAD, PATCH_DIM)

    # class-token + positional-embedding table, tiled to the padded layout
    cls_pos = jnp.zeros((S_PAD, HIDDEN), jnp.float32)
    cls_pos = cls_pos.at[0].set(params["class_emb"] + params["pos_emb"][0])
    cls_pos = cls_pos.at[1:SEQ].set(params["pos_emb"][1:])
    cls_pos = jnp.tile(cls_pos, (B, 1))                 # (B*S_PAD, D)

    # patch-embed matmul (+ folded preprocessing) + cls/pos + pre-LN (1 kernel)
    x0 = embed_tokens(patches, patch_w_folded, patch_bias, cls_pos,
                      params["pre_ln_g"], params["pre_ln_b"])

    # fused transformer encoder (1 kernel, grid over (batch blocks, layers))
    x = transformer_encoder(x0, params["layers"], B)

    # last_hidden_state: (B, num_positions, embedding_dim); no post-layernorm.
    x = x.reshape(B, S_PAD, HIDDEN)
    return x[:, :SEQ, :]


if __name__ == "__main__":
    key = jax.random.PRNGKey(0)
    pkey, ikey = jax.random.split(key)
    params = init_params(pkey)
    # image in value_range (-1, 1), NCHW like the PyTorch module
    image = jax.random.uniform(ikey, (2, 3, 32, 32), jnp.float32,
                               minval=-1.0, maxval=1.0)

    fwd = jax.jit(lambda img: clip_image_grid_embed(img, params))
    out = jax.block_until_ready(fwd(image))

    assert out.shape == (2, SEQ, HIDDEN), out.shape
    assert out.dtype == jnp.float32
    assert bool(jnp.all(jnp.isfinite(out)))
    print("KERNEL_OK")
</pallas_src>

<mosaic_0001>
module attributes {stable_mosaic.version = 11 : i64} {
  func.func @_embed_kernel(%arg0: i32, %arg1: memref<48x48xf32, #tpu.memory_space<vmem>>, %arg2: memref<48x128xf32, #tpu.memory_space<vmem>>, %arg3: memref<1x128xf32, #tpu.memory_space<vmem>>, %arg4: memref<48x128xf32, #tpu.memory_space<vmem>>, %arg5: memref<1x128xf32, #tpu.memory_space<vmem>>, %arg6: memref<1x128xf32, #tpu.memory_space<vmem>>, %arg7: memref<48x128xf32, #tpu.memory_space<vmem>>) attributes {dimension_semantics = [#tpu.dimension_semantics<arbitrary>], iteration_bounds = array<i64: 1>, scalar_prefetch = 0 : i64, scratch_operands = 0 : i64, tpu.core_type = #tpu.core_type<tc>, window_params = [{pipeline_mode = #tpu.pipeline_mode<synchronous>, transform_indices = @transform_0, window_bounds = array<i64: 48, 48>}, {pipeline_mode = #tpu.pipeline_mode<synchronous>, transform_indices = @transform_1, window_bounds = array<i64: 48, 128>}, {pipeline_mode = #tpu.pipeline_mode<synchronous>, transform_indices = @transform_2, window_bounds = array<i64: 1, 128>}, {pipeline_mode = #tpu.pipeline_mode<synchronous>, transform_indices = @transform_3, window_bounds = array<i64: 48, 128>}, {pipeline_mode = #tpu.pipeline_mode<synchronous>, transform_indices = @transform_4, window_bounds = array<i64: 1, 128>}, {pipeline_mode = #tpu.pipeline_mode<synchronous>, transform_indices = @transform_5, window_bounds = array<i64: 1, 128>}, {pipeline_mode = #tpu.pipeline_mode<synchronous>, transform_indices = @transform_6, window_bounds = array<i64: 48, 128>}]} {
    %c0 = arith.constant 0 : index
    %c0_0 = arith.constant 0 : index
    %0 = vector.load %arg1[%c0, %c0_0] : memref<48x48xf32, #tpu.memory_space<vmem>>, vector<48x48xf32>
    %c0_1 = arith.constant 0 : index
    %c0_2 = arith.constant 0 : index
    %1 = vector.load %arg2[%c0_1, %c0_2] : memref<48x128xf32, #tpu.memory_space<vmem>>, vector<48x128xf32>
    %cst = arith.constant dense<0.000000e+00> : vector<48x128xf32>
    %2 = tpu.matmul %0, %1, %cst {dimension_numbers = #tpu.dot_dimension_numbers<[1], [0], [0], [1], [0, 0, 1, 1], [], []>} : vector<48x48xf32>, vector<48x128xf32>, vector<48x128xf32> -> vector<48x128xf32>
    %3 = tpu.iota {dimensions = array<i32: 0>} : vector<48x1xi32>
    %c24_i32 = arith.constant 24 : i32
    %c0_i32 = arith.constant 0 : i32
    %4 = arith.cmpi eq, %c24_i32, %c0_i32 : i32
    %c1_i32 = arith.constant 1 : i32
    %5 = arith.select %4, %c1_i32, %c24_i32 : i32
    %6 = vector.broadcast %5 : i32 to vector<48x1xi32>
    %7 = arith.remsi %3, %6 : vector<48x1xi32>
    %c0_i32_3 = arith.constant 0 : i32
    %8 = vector.broadcast %c0_i32_3 : i32 to vector<48x1xi32>
    %9 = arith.cmpi ne, %7, %8 : vector<48x1xi32>
    %c0_i32_4 = arith.constant 0 : i32
    %10 = vector.broadcast %c0_i32_4 : i32 to vector<48x1xi32>
    %11 = arith.cmpi slt, %7, %10 : vector<48x1xi32>
    %c0_i32_5 = arith.constant 0 : i32
    %12 = arith.cmpi slt, %5, %c0_i32_5 : i32
    %13 = vector.broadcast %12 : i1 to vector<48x1xi1>
    %14 = vector.broadcast %13 : vector<48x1xi1> to vector<48x1xi1>
    %15 = arith.xori %11, %14 : vector<48x1xi1>
    %16 = arith.andi %15, %9 : vector<48x1xi1>
    %17 = vector.broadcast %5 : i32 to vector<48x1xi32>
    %18 = arith.addi %7, %17 : vector<48x1xi32>
    %19 = arith.select %16, %18, %7 : vector<48x1xi1>, vector<48x1xi32>
    %c1_i32_6 = arith.constant 1 : i32
    %20 = vector.broadcast %c1_i32_6 : i32 to vector<48x1xi32>
    %21 = arith.cmpi sge, %19, %20 : vector<48x1xi32>
    %c17_i32 = arith.constant 17 : i32
    %22 = vector.broadcast %c17_i32 : i32 to vector<48x1xi32>
    %23 = arith.cmpi slt, %19, %22 : vector<48x1xi32>
    %24 = arith.andi %21, %23 : vector<48x1xi1>
    %c0_7 = arith.constant 0 : index
    %c0_8 = arith.constant 0 : index
    %25 = vector.load %arg3[%c0_7, %c0_8] : memref<1x128xf32, #tpu.memory_space<vmem>>, vector<1x128xf32>
    %26 = vector.broadcast %25 : vector<1x128xf32> to vector<48x128xf32>
    %27 = arith.addf %2, %26 : vector<48x128xf32>
    %cst_9 = arith.constant 0.000000e+00 : f32
    %28 = vector.shape_cast %24 : vector<48x1xi1> to vector<48x1xi1>
    %29 = vector.broadcast %28 : vector<48x1xi1> to vector<48x128xi1>
    %30 = vector.broadcast %cst_9 : f32 to vector<48x128xf32>
    %31 = arith.select %29, %27, %30 : vector<48x128xi1>, vector<48x128xf32>
    %c0_10 = arith.constant 0 : index
    %c0_11 = arith.constant 0 : index
    %32 = vector.load %arg4[%c0_10, %c0_11] : memref<48x128xf32, #tpu.memory_space<vmem>>, vector<48x128xf32>
    %33 = arith.addf %31, %32 : vector<48x128xf32>
    %c0_12 = arith.constant 0 : index
    %c0_13 = arith.constant 0 : index
    %34 = vector.load %arg5[%c0_12, %c0_13] : memref<1x128xf32, #tpu.memory_space<vmem>>, vector<1x128xf32>
    %c0_14 = arith.constant 0 : index
    %c0_15 = arith.constant 0 : index
    %35 = vector.load %arg6[%c0_14, %c0_15] : memref<1x128xf32, #tpu.memory_space<vmem>>, vector<1x128xf32>
    %cst_16 = arith.constant dense<0.000000e+00> : vector<48xf32>
    %36 = vector.multi_reduction <add>, %33, %cst_16 [1] : vector<48x128xf32> to vector<48xf32>
    %37 = vector.shape_cast %36 : vector<48xf32> to vector<48x1xf32>
    %cst_17 = arith.constant 1.280000e+02 : f32
    %38 = vector.broadcast %cst_17 : f32 to vector<48x1xf32>
    %39 = arith.divf %37, %38 : vector<48x1xf32>
    %40 = vector.broadcast %39 : vector<48x1xf32> to vector<48x128xf32>
    %41 = arith.subf %33, %40 : vector<48x128xf32>
    %42 = arith.mulf %41, %41 : vector<48x128xf32>
    %cst_18 = arith.constant dense<0.000000e+00> : vector<48xf32>
    %43 = vector.multi_reduction <add>, %42, %cst_18 [1] : vector<48x128xf32> to vector<48xf32>
    %44 = vector.shape_cast %43 : vector<48xf32> to vector<48x1xf32>
    %cst_19 = arith.constant 1.280000e+02 : f32
    %45 = vector.broadcast %cst_19 : f32 to vector<48x1xf32>
    %46 = arith.divf %44, %45 : vector<48x1xf32>
    %cst_20 = arith.constant 9.99999974E-6 : f32
    %47 = vector.broadcast %cst_20 : f32 to vector<48x1xf32>
    %48 = arith.addf %46, %47 : vector<48x1xf32>
    %49 = math.rsqrt %48 : vector<48x1xf32>
    %50 = vector.broadcast %49 : vector<48x1xf32> to vector<48x128xf32>
    %51 = arith.mulf %41, %50 : vector<48x128xf32>
    %52 = vector.broadcast %34 : vector<1x128xf32> to vector<48x128xf32>
    %53 = arith.mulf %51, %52 : vector<48x128xf32>
    %54 = vector.broadcast %35 : vector<1x128xf32> to vector<48x128xf32>
    %55 = arith.addf %53, %54 : vector<48x128xf32>
    %c17_i32_21 = arith.constant 17 : i32
    %56 = vector.broadcast %c17_i32_21 : i32 to vector<48x1xi32>
    %57 = arith.cmpi slt, %19, %56 : vector<48x1xi32>
    %cst_22 = arith.constant 0.000000e+00 : f32
    %58 = vector.shape_cast %57 : vector<48x1xi1> to vector<48x1xi1>
    %59 = vector.broadcast %58 : vector<48x1xi1> to vector<48x128xi1>
    %60 = vector.broadcast %cst_22 : f32 to vector<48x128xf32>
    %61 = arith.select %59, %55, %60 : vector<48x128xi1>, vector<48x128xf32>
    %c0_23 = arith.constant 0 : index
    %c0_24 = arith.constant 0 : index
    %62 = vector.load %arg7[%c0_23, %c0_24] : memref<48x128xf32, #tpu.memory_space<vmem>>, vector<48x128xf32>
    tpu.vector_store %arg7[%c0_23, %c0_24], %61 {strides = array<i32>} : memref<48x128xf32, #tpu.memory_space<vmem>>, vector<48x128xf32>,
    return
  }
  func.func @transform_0(%arg0: i32) -> (i32, i32) {
    %c0_i32 = arith.constant 0 : i32
    %c0_i32_0 = arith.constant 0 : i32
    %c0_i32_1 = arith.constant 0 : i32
    return %c0_i32, %c0_i32_0 : i32, i32
  }
  func.func @transform_1(%arg0: i32) -> (i32, i32) {
    %c0_i32 = arith.constant 0 : i32
    %c0_i32_0 = arith.constant 0 : i32
    %c0_i32_1 = arith.constant 0 : i32
    return %c0_i32, %c0_i32_0 : i32, i32
  }
  func.func @transform_2(%arg0: i32) -> (i32, i32) {
    %c0_i32 = arith.constant 0 : i32
    %c0_i32_0 = arith.constant 0 : i32
    %c0_i32_1 = arith.constant 0 : i32
    return %c0_i32, %c0_i32_0 : i32, i32
  }
  func.func @transform_3(%arg0: i32) -> (i32, i32) {
    %c0_i32 = arith.constant 0 : i32
    %c0_i32_0 = arith.constant 0 : i32
    %c0_i32_1 = arith.constant 0 : i32
    return %c0_i32, %c0_i32_0 : i32, i32
  }
  func.func @transform_4(%arg0: i32) -> (i32, i32) {
    %c0_i32 = arith.constant 0 : i32
    %c0_i32_0 = arith.constant 0 : i32
    %c0_i32_1 = arith.constant 0 : i32
    return %c0_i32, %c0_i32_0 : i32, i32
  }
  func.func @transform_5(%arg0: i32) -> (i32, i32) {
    %c0_i32 = arith.constant 0 : i32
    %c0_i32_0 = arith.constant 0 : i32
    %c0_i32_1 = arith.constant 0 : i32
    return %c0_i32, %c0_i32_0 : i32, i32
  }
  func.func @transform_6(%arg0: i32) -> (i32, i32) {
    %c0_i32 = arith.constant 0 : i32
    %c0_i32_0 = arith.constant 0 : i32
    %c0_i32_1 = arith.constant 0 : i32
    return %c0_i32, %c0_i32_0 : i32, i32
  }
}

module attributes {stable_mosaic.version = 11 : i64} {
  func.func @_encoder_kernel(%arg0: i32, %arg1: i32, %arg2: memref<24x128xf32, #tpu.memory_space<vmem>>, %arg3: memref<1x8x512xf32, #tpu.memory_space<vmem>>, %arg4: memref<1x128x384xf32, #tpu.memory_space<vmem>>, %arg5: memref<1x128x128xf32, #tpu.memory_space<vmem>>, %arg6: memref<1x128x512xf32, #tpu.memory_space<vmem>>, %arg7: memref<1x512x128xf32, #tpu.memory_space<vmem>>, %arg8: memref<24x128xf32, #tpu.memory_space<vmem>>) attributes {dimension_semantics = [#tpu.dimension_semantics<parallel>, #tpu.dimension_semantics<arbitrary>], iteration_bounds = array<i64: 2, 2>, scalar_prefetch = 0 : i64, scratch_operands = 0 : i64, tpu.core_type = #tpu.core_type<tc>, window_params = [{transform_indices = @transform_0, window_bounds = array<i64: 24, 128>}, {transform_indices = @transform_1, window_bounds = array<i64: 1, 8, 512>}, {transform_indices = @transform_2, window_bounds = array<i64: 1, 128, 384>}, {transform_indices = @transform_3, window_bounds = array<i64: 1, 128, 128>}, {transform_indices = @transform_4, window_bounds = array<i64: 1, 128, 512>}, {transform_indices = @transform_5, window_bounds = array<i64: 1, 512, 128>}, {transform_indices = @transform_6, window_bounds = array<i64: 24, 128>}]} {
    %c0_i32 = arith.constant 0 : i32
    %0 = arith.cmpi eq, %arg1, %c0_i32 : i32
    %1 = arith.extui %0 : i1 to i32
    %c0_i32_0 = arith.constant 0 : i32
    %2 = arith.cmpi ne, %1, %c0_i32_0 : i32
    scf.if %2 {
      %c0_46 = arith.constant 0 : index
      %c0_47 = arith.constant 0 : index
      %136 = vector.load %arg2[%c0_46, %c0_47] : memref<24x128xf32, #tpu.memory_space<vmem>>, vector<24x128xf32>
      %c0_48 = arith.constant 0 : index
      %c0_49 = arith.constant 0 : index
      %137 = vector.load %arg8[%c0_48, %c0_49] : memref<24x128xf32, #tpu.memory_space<vmem>>, vector<24x128xf32>
      tpu.vector_store %arg8[%c0_48, %c0_49], %136 {strides = array<i32>} : memref<24x128xf32, #tpu.memory_space<vmem>>, vector<24x128xf32>,
    } else {
    }
    %c0 = arith.constant 0 : index
    %c0_1 = arith.constant 0 : index
    %3 = vector.load %arg8[%c0, %c0_1] : memref<24x128xf32, #tpu.memory_space<vmem>>, vector<24x128xf32>
    %c0_2 = arith.constant 0 : index
    %c0_3 = arith.constant 0 : index
    %c0_4 = arith.constant 0 : index
    %4 = vector.load %arg3[%c0_2, %c0_3, %c0_4] : memref<1x8x512xf32, #tpu.memory_space<vmem>>, vector<1x8x512xf32>
    %5 = vector.shape_cast %4 : vector<1x8x512xf32> to vector<8x512xf32>
    %6 = vector.extract_strided_slice %5 {offsets = [0, 0], sizes = [1, 128], strides = [1, 1]} : vector<8x512xf32> to vector<1x128xf32>
    %7 = vector.extract_strided_slice %5 {offsets = [1, 0], sizes = [1, 128], strides = [1, 1]} : vector<8x512xf32> to vector<1x128xf32>
    %8 = vector.extract_strided_slice %5 {offsets = [2, 0], sizes = [1, 384], strides = [1, 1]} : vector<8x512xf32> to vector<1x384xf32>
    %9 = vector.extract_strided_slice %5 {offsets = [3, 0], sizes = [1, 128], strides = [1, 1]} : vector<8x512xf32> to vector<1x128xf32>
    %10 = vector.extract_strided_slice %5 {offsets = [4, 0], sizes = [1, 128], strides = [1, 1]} : vector<8x512xf32> to vector<1x128xf32>
    %11 = vector.extract_strided_slice %5 {offsets = [5, 0], sizes = [1, 128], strides = [1, 1]} : vector<8x512xf32> to vector<1x128xf32>
    %12 = vector.extract_strided_slice %5 {offsets = [6, 0], sizes = [1, 512], strides = [1, 1]} : vector<8x512xf32> to vector<1x512xf32>
    %13 = vector.extract_strided_slice %5 {offsets = [7, 0], sizes = [1, 128], strides = [1, 1]} : vector<8x512xf32> to vector<1x128xf32>
    %cst = arith.constant dense<0.000000e+00> : vector<24xf32>
    %14 = vector.multi_reduction <add>, %3, %cst [1] : vector<24x128xf32> to vector<24xf32>
    %15 = vector.shape_cast %14 : vector<24xf32> to vector<24x1xf32>
    %cst_5 = arith.constant 1.280000e+02 : f32
    %16 = vector.broadcast %cst_5 : f32 to vector<24x1xf32>
    %17 = arith.divf %15, %16 : vector<24x1xf32>
    %18 = vector.broadcast %17 : vector<24x1xf32> to vector<24x128xf32>
    %19 = arith.subf %3, %18 : vector<24x128xf32>
    %20 = arith.mulf %19, %19 : vector<24x128xf32>
    %cst_6 = arith.constant dense<0.000000e+00> : vector<24xf32>
    %21 = vector.multi_reduction <add>, %20, %cst_6 [1] : vector<24x128xf32> to vector<24xf32>
    %22 = vector.shape_cast %21 : vector<24xf32> to vector<24x1xf32>
    %cst_7 = arith.constant 1.280000e+02 : f32
    %23 = vector.broadcast %cst_7 : f32 to vector<24x1xf32>
    %24 = arith.divf %22, %23 : vector<24x1xf32>
    %cst_8 = arith.constant 9.99999974E-6 : f32
    %25 = vector.broadcast %cst_8 : f32 to vector<24x1xf32>
    %26 = arith.addf %24, %25 : vector<24x1xf32>
    %27 = math.rsqrt %26 : vector<24x1xf32>
    %28 = vector.broadcast %27 : vector<24x1xf32> to vector<24x128xf32>
    %29 = arith.mulf %19, %28 : vector<24x128xf32>
    %30 = vector.broadcast %6 : vector<1x128xf32> to vector<24x128xf32>
    %31 = arith.mulf %29, %30 : vector<24x128xf32>
    %32 = vector.broadcast %7 : vector<1x128xf32> to vector<24x128xf32>
    %33 = arith.addf %31, %32 : vector<24x128xf32>
    %c0_9 = arith.constant 0 : index
    %c0_10 = arith.constant 0 : index
    %c0_11 = arith.constant 0 : index
    %34 = vector.load %arg4[%c0_9, %c0_10, %c0_11] : memref<1x128x384xf32, #tpu.memory_space<vmem>>, vector<1x128x384xf32>
    %35 = vector.shape_cast %34 : vector<1x128x384xf32> to vector<128x384xf32>
    %cst_12 = arith.constant dense<0.000000e+00> : vector<24x384xf32>
    %36 = tpu.matmul %33, %35, %cst_12 {dimension_numbers = #tpu.dot_dimension_numbers<[1], [0], [0], [1], [0, 0, 1, 1], [], []>} : vector<24x128xf32>, vector<128x384xf32>, vector<24x384xf32> -> vector<24x384xf32>
    %37 = vector.broadcast %8 : vector<1x384xf32> to vector<24x384xf32>
    %38 = arith.addf %36, %37 : vector<24x384xf32>
    %39 = vector.extract_strided_slice %38 {offsets = [0, 0], sizes = [24, 128], strides = [1, 1]} : vector<24x384xf32> to vector<24x128xf32>
    %cst_13 = arith.constant 1.250000e-01 : f32
    %40 = vector.broadcast %cst_13 : f32 to vector<24x128xf32>
    %41 = arith.mulf %39, %40 : vector<24x128xf32>
    %42 = vector.extract_strided_slice %38 {offsets = [0, 128], sizes = [24, 128], strides = [1, 1]} : vector<24x384xf32> to vector<24x128xf32>
    %43 = vector.extract_strided_slice %38 {offsets = [0, 256], sizes = [24, 128], strides = [1, 1]} : vector<24x384xf32> to vector<24x128xf32>
    %c0_14 = arith.constant 0 : index
    %c0_15 = arith.constant 0 : index
    %c0_16 = arith.constant 0 : index
    %44 = vector.load %arg5[%c0_14, %c0_15, %c0_16] : memref<1x128x128xf32, #tpu.memory_space<vmem>>, vector<1x128x128xf32>
    %45 = vector.shape_cast %44 : vector<1x128x128xf32> to vector<128x128xf32>
    %46 = tpu.iota {dimensions = array<i32: 1>} : vector<1x24xi32>
    %c17_i32 = arith.constant 17 : i32
    %47 = vector.broadcast %c17_i32 : i32 to vector<1x24xi32>
    %48 = arith.cmpi slt, %46, %47 : vector<1x24xi32>
    %49 = tpu.transpose %42, [1, 0] : vector<24x128xf32> -> vector<128x24xf32>
    %50 = vector.extract_strided_slice %41 {offsets = [0, 0], sizes = [24, 64], strides = [1, 1]} : vector<24x128xf32> to vector<24x64xf32>
    %51 = vector.extract_strided_slice %49 {offsets = [0, 0], sizes = [64, 24], strides = [1, 1]} : vector<128x24xf32> to vector<64x24xf32>
    %cst_17 = arith.constant dense<0.000000e+00> : vector<24x24xf32>
    %52 = tpu.matmul %50, %51, %cst_17 {dimension_numbers = #tpu.dot_dimension_numbers<[1], [0], [0], [1], [0, 0, 1, 1], [], []>} : vector<24x64xf32>, vector<64x24xf32>, vector<24x24xf32> -> vector<24x24xf32>
    %cst_18 = arith.constant -1.000000e+30 : f32
    %53 = vector.shape_cast %48 : vector<1x24xi1> to vector<1x24xi1>
    %54 = vector.broadcast %53 : vector<1x24xi1> to vector<24x24xi1>
    %55 = vector.broadcast %cst_18 : f32 to vector<24x24xf32>
    %56 = arith.select %54, %52, %55 : vector<24x24xi1>, vector<24x24xf32>
    %cst_19 = arith.constant dense<0xFF800000> : vector<24xf32>
    %57 = vector.multi_reduction <maximumf>, %56, %cst_19 [1] : vector<24x24xf32> to vector<24xf32>
    %58 = vector.shape_cast %57 : vector<24xf32> to vector<24x1xf32>
    %59 = vector.broadcast %58 : vector<24x1xf32> to vector<24x24xf32>
    %60 = arith.subf %56, %59 : vector<24x24xf32>
    %61 = math.exp %60 : vector<24x24xf32>
    %cst_20 = arith.constant dense<0.000000e+00> : vector<24xf32>
    %62 = vector.multi_reduction <add>, %61, %cst_20 [1] : vector<24x24xf32> to vector<24xf32>
    %63 = vector.shape_cast %62 : vector<24xf32> to vector<24x1xf32>
    %64 = tpu.reciprocal %63 {approx = true} : vector<24x1xf32> -> vector<24x1xf32>
    %65 = vector.broadcast %64 : vector<24x1xf32> to vector<24x24xf32>
    %66 = arith.mulf %61, %65 : vector<24x24xf32>
    %67 = vector.extract_strided_slice %43 {offsets = [0, 0], sizes = [24, 64], strides = [1, 1]} : vector<24x128xf32> to vector<24x64xf32>
    %cst_21 = arith.constant dense<0.000000e+00> : vector<24x64xf32>
    %68 = tpu.matmul %66, %67, %cst_21 {dimension_numbers = #tpu.dot_dimension_numbers<[1], [0], [0], [1], [0, 0, 1, 1], [], []>} : vector<24x24xf32>, vector<24x64xf32>, vector<24x64xf32> -> vector<24x64xf32>
    %69 = vector.extract_strided_slice %45 {offsets = [0, 0], sizes = [64, 128], strides = [1, 1]} : vector<128x128xf32> to vector<64x128xf32>
    %cst_22 = arith.constant dense<0.000000e+00> : vector<24x128xf32>
    %70 = tpu.matmul %68, %69, %cst_22 {dimension_numbers = #tpu.dot_dimension_numbers<[1], [0], [0], [1], [0, 0, 1, 1], [], []>} : vector<24x64xf32>, vector<64x128xf32>, vector<24x128xf32> -> vector<24x128xf32>
    %71 = vector.extract_strided_slice %41 {offsets = [0, 64], sizes = [24, 64], strides = [1, 1]} : vector<24x128xf32> to vector<24x64xf32>
    %72 = vector.extract_strided_slice %49 {offsets = [64, 0], sizes = [64, 24], strides = [1, 1]} : vector<128x24xf32> to vector<64x24xf32>
    %cst_23 = arith.constant dense<0.000000e+00> : vector<24x24xf32>
    %73 = tpu.matmul %71, %72, %cst_23 {dimension_numbers = #tpu.dot_dimension_numbers<[1], [0], [0], [1], [0, 0, 1, 1], [], []>} : vector<24x64xf32>, vector<64x24xf32>, vector<24x24xf32> -> vector<24x24xf32>
    %cst_24 = arith.constant -1.000000e+30 : f32
    %74 = vector.shape_cast %48 : vector<1x24xi1> to vector<1x24xi1>
    %75 = vector.broadcast %74 : vector<1x24xi1> to vector<24x24xi1>
    %76 = vector.broadcast %cst_24 : f32 to vector<24x24xf32>
    %77 = arith.select %75, %73, %76 : vector<24x24xi1>, vector<24x24xf32>
    %cst_25 = arith.constant dense<0xFF800000> : vector<24xf32>
    %78 = vector.multi_reduction <maximumf>, %77, %cst_25 [1] : vector<24x24xf32> to vector<24xf32>
    %79 = vector.shape_cast %78 : vector<24xf32> to vector<24x1xf32>
    %80 = vector.broadcast %79 : vector<24x1xf32> to vector<24x24xf32>
    %81 = arith.subf %77, %80 : vector<24x24xf32>
    %82 = math.exp %81 : vector<24x24xf32>
    %cst_26 = arith.constant dense<0.000000e+00> : vector<24xf32>
    %83 = vector.multi_reduction <add>, %82, %cst_26 [1] : vector<24x24xf32> to vector<24xf32>
    %84 = vector.shape_cast %83 : vector<24xf32> to vector<24x1xf32>
    %85 = tpu.reciprocal %84 {approx = true} : vector<24x1xf32> -> vector<24x1xf32>
    %86 = vector.broadcast %85 : vector<24x1xf32> to vector<24x24xf32>
    %87 = arith.mulf %82, %86 : vector<24x24xf32>
    %88 = vector.extract_strided_slice %43 {offsets = [0, 64], sizes = [24, 64], strides = [1, 1]} : vector<24x128xf32> to vector<24x64xf32>
    %cst_27 = arith.constant dense<0.000000e+00> : vector<24x64xf32>
    %89 = tpu.matmul %87, %88, %cst_27 {dimension_numbers = #tpu.dot_dimension_numbers<[1], [0], [0], [1], [0, 0, 1, 1], [], []>} : vector<24x24xf32>, vector<24x64xf32>, vector<24x64xf32> -> vector<24x64xf32>
    %90 = vector.extract_strided_slice %45 {offsets = [64, 0], sizes = [64, 128], strides = [1, 1]} : vector<128x128xf32> to vector<64x128xf32>
    %cst_28 = arith.constant dense<0.000000e+00> : vector<24x128xf32>
    %91 = tpu.matmul %89, %90, %cst_28 {dimension_numbers = #tpu.dot_dimension_numbers<[1], [0], [0], [1], [0, 0, 1, 1], [], []>} : vector<24x64xf32>, vector<64x128xf32>, vector<24x128xf32> -> vector<24x128xf32>
    %92 = arith.addf %70, %91 : vector<24x128xf32>
    %93 = vector.broadcast %9 : vector<1x128xf32> to vector<24x128xf32>
    %94 = arith.addf %92, %93 : vector<24x128xf32>
    %95 = arith.addf %94, %3 : vector<24x128xf32>
    %cst_29 = arith.constant dense<0.000000e+00> : vector<24xf32>
    %96 = vector.multi_reduction <add>, %95, %cst_29 [1] : vector<24x128xf32> to vector<24xf32>
    %97 = vector.shape_cast %96 : vector<24xf32> to vector<24x1xf32>
    %cst_30 = arith.constant 1.280000e+02 : f32
    %98 = vector.broadcast %cst_30 : f32 to vector<24x1xf32>
    %99 = arith.divf %97, %98 : vector<24x1xf32>
    %100 = vector.broadcast %99 : vector<24x1xf32> to vector<24x128xf32>
    %101 = arith.subf %95, %100 : vector<24x128xf32>
    %102 = arith.mulf %101, %101 : vector<24x128xf32>
    %cst_31 = arith.constant dense<0.000000e+00> : vector<24xf32>
    %103 = vector.multi_reduction <add>, %102, %cst_31 [1] : vector<24x128xf32> to vector<24xf32>
    %104 = vector.shape_cast %103 : vector<24xf32> to vector<24x1xf32>
    %cst_32 = arith.constant 1.280000e+02 : f32
    %105 = vector.broadcast %cst_32 : f32 to vector<24x1xf32>
    %106 = arith.divf %104, %105 : vector<24x1xf32>
    %cst_33 = arith.constant 9.99999974E-6 : f32
    %107 = vector.broadcast %cst_33 : f32 to vector<24x1xf32>
    %108 = arith.addf %106, %107 : vector<24x1xf32>
    %109 = math.rsqrt %108 : vector<24x1xf32>
    %110 = vector.broadcast %109 : vector<24x1xf32> to vector<24x128xf32>
    %111 = arith.mulf %101, %110 : vector<24x128xf32>
    %112 = vector.broadcast %10 : vector<1x128xf32> to vector<24x128xf32>
    %113 = arith.mulf %111, %112 : vector<24x128xf32>
    %114 = vector.broadcast %11 : vector<1x128xf32> to vector<24x128xf32>
    %115 = arith.addf %113, %114 : vector<24x128xf32>
    %c0_34 = arith.constant 0 : index
    %c0_35 = arith.constant 0 : index
    %c0_36 = arith.constant 0 : index
    %116 = vector.load %arg6[%c0_34, %c0_35, %c0_36] : memref<1x128x512xf32, #tpu.memory_space<vmem>>, vector<1x128x512xf32>
    %117 = vector.shape_cast %116 : vector<1x128x512xf32> to vector<128x512xf32>
    %cst_37 = arith.constant dense<0.000000e+00> : vector<24x512xf32>
    %118 = tpu.matmul %115, %117, %cst_37 {dimension_numbers = #tpu.dot_dimension_numbers<[1], [0], [0], [1], [0, 0, 1, 1], [], []>} : vector<24x128xf32>, vector<128x512xf32>, vector<24x512xf32> -> vector<24x512xf32>
    %119 = vector.broadcast %12 : vector<1x512xf32> to vector<24x512xf32>
    %120 = arith.addf %118, %119 : vector<24x512xf32>
    %cst_38 = arith.constant 1.702000e+00 : f32
    %121 = vector.broadcast %cst_38 : f32 to vector<24x512xf32>
    %122 = arith.mulf %121, %120 : vector<24x512xf32>
    %123 = arith.negf %122 : vector<24x512xf32>
    %124 = math.exp %123 : vector<24x512xf32>
    %cst_39 = arith.constant 1.000000e+00 : f32
    %125 = vector.broadcast %cst_39 : f32 to vector<24x512xf32>
    %126 = arith.addf %125, %124 : vector<24x512xf32>
    %127 = arith.divf %125, %126 : vector<24x512xf32>
    %128 = arith.mulf %120, %127 : vector<24x512xf32>
    %c0_40 = arith.constant 0 : index
    %c0_41 = arith.constant 0 : index
    %c0_42 = arith.constant 0 : index
    %129 = vector.load %arg7[%c0_40, %c0_41, %c0_42] : memref<1x512x128xf32, #tpu.memory_space<vmem>>, vector<1x512x128xf32>
    %130 = vector.shape_cast %129 : vector<1x512x128xf32> to vector<512x128xf32>
    %cst_43 = arith.constant dense<0.000000e+00> : vector<24x128xf32>
    %131 = tpu.matmul %128, %130, %cst_43 {dimension_numbers = #tpu.dot_dimension_numbers<[1], [0], [0], [1], [0, 0, 1, 1], [], []>} : vector<24x512xf32>, vector<512x128xf32>, vector<24x128xf32> -> vector<24x128xf32>
    %132 = vector.broadcast %13 : vector<1x128xf32> to vector<24x128xf32>
    %133 = arith.addf %131, %132 : vector<24x128xf32>
    %134 = arith.addf %133, %95 : vector<24x128xf32>
    %c0_44 = arith.constant 0 : index
    %c0_45 = arith.constant 0 : index
    %135 = vector.load %arg8[%c0_44, %c0_45] : memref<24x128xf32, #tpu.memory_space<vmem>>, vector<24x128xf32>
    tpu.vector_store %arg8[%c0_44, %c0_45], %134 {strides = array<i32>} : memref<24x128xf32, #tpu.memory_space<vmem>>, vector<24x128xf32>,
    return
  }
  func.func @transform_0(%arg0: i32, %arg1: i32) -> (i32, i32) {
    %c0_i32 = arith.constant 0 : i32
    %c0_i32_0 = arith.constant 0 : i32
    return %arg0, %c0_i32 : i32, i32
  }
  func.func @transform_1(%arg0: i32, %arg1: i32) -> (i32, i32, i32) {
    %c0_i32 = arith.constant 0 : i32
    %c0_i32_0 = arith.constant 0 : i32
    %c0_i32_1 = arith.constant 0 : i32
    return %arg1, %c0_i32, %c0_i32_0 : i32, i32, i32
  }
  func.func @transform_2(%arg0: i32, %arg1: i32) -> (i32, i32, i32) {
    %c0_i32 = arith.constant 0 : i32
    %c0_i32_0 = arith.constant 0 : i32
    %c0_i32_1 = arith.constant 0 : i32
    return %arg1, %c0_i32, %c0_i32_0 : i32, i32, i32
  }
  func.func @transform_3(%arg0: i32, %arg1: i32) -> (i32, i32, i32) {
    %c0_i32 = arith.constant 0 : i32
    %c0_i32_0 = arith.constant 0 : i32
    %c0_i32_1 = arith.constant 0 : i32
    return %arg1, %c0_i32, %c0_i32_0 : i32, i32, i32
  }
  func.func @transform_4(%arg0: i32, %arg1: i32) -> (i32, i32, i32) {
    %c0_i32 = arith.constant 0 : i32
    %c0_i32_0 = arith.constant 0 : i32
    %c0_i32_1 = arith.constant 0 : i32
    return %arg1, %c0_i32, %c0_i32_0 : i32, i32, i32
  }
  func.func @transform_5(%arg0: i32, %arg1: i32) -> (i32, i32, i32) {
    %c0_i32 = arith.constant 0 : i32
    %c0_i32_0 = arith.constant 0 : i32
    %c0_i32_1 = arith.constant 0 : i32
    return %arg1, %c0_i32, %c0_i32_0 : i32, i32, i32
  }
  func.func @transform_6(%arg0: i32, %arg1: i32) -> (i32, i32) {
    %c0_i32 = arith.constant 0 : i32
    %c0_i32_0 = arith.constant 0 : i32
    return %arg0, %c0_i32 : i32, i32
  }
}

</mosaic_0001>

<bundles_post_ra>
// kernel: mul.13
= control target key start
LH: loop header
LB: loop body
LE: loop exit
PB: predicated region body
PF: predicated region fallthrough
CT: control target
= control target key end

     0   :  { %s30_s8 = smov 16   ;;  %vm7_vm0 = vcmask 130048   ;;  %vm13_vm1 = vcmask 392448   ;;  %vm19_vm2 = vcmask 261248   ;;  %s47_s0 = inlined_call_operand.vmem [shape: f32[3,16], index: 0, kind: input, shape index: {}]   ;;  %s48_s1 = inlined_call_operand.vmem [shape: f32[48], index: 1, kind: output, shape index: {}]  }
   0x1   :  { %v4_v0 = vld [vmem:[%s47_s0] sm:$0xf]  ;;  %s29_s0 = smov 32  }
   0x2   :  { %5 = vst [vmem:[#allocation1] sm:$0xf] %v4_v0 }
   0x9   :  { %v10_v1 = vld [vmem:[#allocation1 + $0x2] sm:$0x1]   ;;  %v16_v2 = vld [vmem:[#allocation1 + $0x1] sm:$0x1]   ;;  %v6_v3 = vld [vmem:[#allocation1] sm:$0x1]  }
   0xa   :  { %11 = vrot.lane.b32.xlu0 %v10_v1, %s29_s0  ;;  %8 = vst.msk [vmem:[#allocation0] sm:$0x1] %vm7_vm0, %v6_v3  }
  0x12   :  { %17 = vrot.lane.b32.xlu0 %v16_v2, %s30_s8 }
  0x7c   :  { %v12_v4 = vpop.permute.xlu0 %11  }
  0x7d   :  { %14 = vst.msk [vmem:[#allocation0] sm:$0x1] %vm13_vm1, %v12_v4  }
  0x84   :  { %v18_v5 = vpop.permute.xlu0 %17  }
  0x85   :  { %20 = vst.msk [vmem:[#allocation0] sm:$0x1] %vm19_vm2, %v18_v5  }
  0x8c   :  { %v23_v6 = vld [vmem:[#allocation0] sm:$0x1] }
  0x8d   :  { %26 = vst [vmem:[%s48_s1] sm:$0x1] %v23_v6 }

// kernel: _lambda_.2
= control target key start
LH: loop header
LB: loop body
LE: loop exit
PB: predicated region body
PF: predicated region fallthrough
CT: control target
= control target key end

     0   :  { %vm268_vm0 = vcmask 392192   ;;  %v35_v12 = vlaneseq  ;;  %v570_v25 = vmov 0   ;;  %s872_s1 = inlined_call_operand.vmem [shape: f32[48,128], index: 1, kind: input, shape index: {}]   ;;  %s873_s2 = inlined_call_operand.vmem [shape: f32[1,128], index: 2, kind: input, shape index: {}]   ;;  %s874_s0 = inlined_call_operand.vmem [shape: f32[48,48], index: 0, kind: input, shape index: {}]   ;;  %s875_s3 = inlined_call_operand.vmem [shape: f32[48,128], index: 3, kind: input, shape index: {}]   ;;  %s876_s4 = inlined_call_operand.vmem [shape: f32[1,128], index: 4, kind: input, shape index: {}]   ;;  %s877_s5 = inlined_call_operand.vmem [shape: f32[1,128], index: 5, kind: input, shape index: {}]   ;;  %s878_s6 = inlined_call_operand.vmem [shape: f32[48,128], index: 6, kind: output, shape index: {}]  }
   0x1   :  { %v34_v0 = vld [vmem:[%s872_s1 + $0x28] sm:$0xff]  ;;  %v33_v1 = vld [vmem:[%s872_s1 + $0x20] sm:$0xff]  ;;  %v32_v2 = vld [vmem:[%s872_s1 + $0x18] sm:$0xff] }
   0x2   :  { %297 = vmatpush.msra.mxu0 %v34_v0  ;;  %533 = vmatpush.msra.mxu1 %v34_v0  ;;  %v31_v3 = vld [vmem:[%s872_s1 + $0x10] sm:$0xff]  ;;  %v30_v4 = vld [vmem:[%s872_s1 + $0x8] sm:$0xff]  ;;  %v29_v5 = vld [vmem:[%s872_s1] sm:$0xff]  ;;  %v649_v13 = vshrl.u32 %v35_v12, 7 }
   0x3   :  { %535 = vmatpush.msra.mxu3 %v34_v0  ;;  %534 = vmatpush.msra.mxu2 %v34_v0  ;;  %v23_v6 = vld [vmem:[%s874_s0] sm:$0xff]  ;;  %v24_v7 = vld [vmem:[%s874_s0 + $0x8] sm:$0xff]  ;;  %v26_v9 = vld [vmem:[%s874_s0 + $0x18] sm:$0xff] }
   0x4   :  { %298 = vmatpush.msra.mxu0 %v33_v1  ;;  %536 = vmatpush.msra.mxu1 %v33_v1  ;;  %v27_v8 = vld [vmem:[%s874_s0 + $0x20] sm:$0xff]  ;;  %v25_v10 = vld [vmem:[%s874_s0 + $0x10] sm:$0xff]  ;;  %v28_v11 = vld [vmem:[%s874_s0 + $0x28] sm:$0xff]  ;;  %v652_v14 = vadd.s32 8, %v649_v13  ;;  %v45_v15 = vand.u32 65535, %v649_v13  ;;  %v46_v16 = vshrl.u32 %v649_v13, 16 }
   0x5   :  { %538 = vmatpush.msra.mxu3 %v33_v1  ;;  %537 = vmatpush.msra.mxu2 %v33_v1  ;;  %v658_v22 = vadd.s32 32, %v649_v13  ;;  %v663_v29 = vadd.s32 16, %v649_v13 }
   0x6   :  { %299 = vmatpush.msra.mxu0 %v32_v2  ;;  %539 = vmatpush.msra.mxu1 %v32_v2  ;;  %v49_v17 = vmul.u32 43690, %v45_v15  ;;  %v74_v18 = vand.u32 65535, %v652_v14  ;;  %v48_v19 = vmul.u32 43691, %v45_v15  ;;  %v50_v20 = vmul.u32 43691, %v46_v16 }
   0x7   :  { %541 = vmatpush.msra.mxu3 %v32_v2  ;;  %540 = vmatpush.msra.mxu2 %v32_v2  ;;  %v51_v23 = vmul.u32 43690, %v46_v16  ;;  %v161_v28 = vand.u32 65535, %v658_v22  ;;  %v162_v30 = vshrl.u32 %v658_v22, 16  ;;  %v103_v33 = vand.u32 65535, %v663_v29 }
   0x8   :  { %300 = vmatpush.msra.mxu0 %v31_v3  ;;  %542 = vmatpush.msra.mxu1 %v31_v3  ;;  %v52_v21 = vshll.u32 %v49_v17, 16  ;;  %v54_v24 = vshll.u32 %v50_v20, 16  ;;  %v666_v31 = vmul.u32 43690, %v74_v18  ;;  %v75_v36 = vshrl.u32 %v652_v14, 16 }
   0x9   :  { %544 = vmatpush.msra.mxu3 %v31_v3  ;;  %543 = vmatpush.msra.mxu2 %v31_v3  ;;  %v165_v32 = vmul.u32 43690, %v161_v28  ;;  %v164_v35 = vmul.u32 43691, %v161_v28  ;;  %v670_v37 = vmul.u32 43691, %v162_v30  ;;  %v104_v39 = vshrl.u32 %v663_v29, 16 }
   0xa   :  { %301 = vmatpush.msra.mxu0 %v30_v4  ;;  %545 = vmatpush.msra.mxu1 %v30_v4  ;;  %vm56_vm1 = vc.u32 %v48_v19, %v52_v21  ;;  %v58_v27 = vadd.s32 %v52_v21, %v48_v19  ;;  %v107_v40 = vmul.u32 43690, %v103_v33  ;;  %v77_v42 = vmul.u32 43691, %v74_v18 }
   0xb   :  { %547 = vmatpush.msra.mxu3 %v30_v4  ;;  %546 = vmatpush.msra.mxu2 %v30_v4  ;;  %v57_v26 = vsel %vm56_vm1, 1, %v570_v25  ;;  %v168_v38 = vshll.u32 %v165_v32, 16  ;;  %v81_v43 = vshll.u32 %v666_v31, 16  ;;  %v106_v44 = vmul.u32 43691, %v103_v33 }
   0xc   :  { %302 = vmatpush.msra.mxu0 %v29_v5  ;;  %548 = vmatpush.msra.mxu1 %v29_v5  ;;  %vm60_vm2 = vc.u32 %v58_v27, %v54_v24  ;;  %v59_v34 = vadd.s32 %v57_v26, %v51_v23  ;;  %v675_v45 = vmul.u32 43691, %v104_v39  ;;  %v53_v46 = vshrl.u32 %v49_v17, 16 }
   0xd   :  { %550 = vmatpush.msra.mxu3 %v29_v5  ;;  %527 = vmatmul.msk.f32.vlgmr.msra.gmra.mxu0 %vm268_vm0, %v23_v6  ;;  %v61_v41 = vsel %vm60_vm2, 1, %v570_v25  ;;  %v110_v47 = vshll.u32 %v107_v40, 16  ;;  %v79_v48 = vmul.u32 43691, %v75_v36  ;;  %v170_v50 = vshll.u32 %v670_v37, 16 }
   0xe   :  { %528 = vmatmul.msk.f32.vlgmr.msra.gmra.mxu1 %vm268_vm0, %v24_v7  ;;  %531 = vmatmul.msk.f32.vlgmr.msra.gmra.mxu3 %vm268_vm0, %v27_v8  ;;  %v63_v49 = vadd.s32 %v61_v41, %v59_v34  ;;  %vm172_vm3 = vc.u32 %v164_v35, %v168_v38  ;;  %v174_v51 = vadd.s32 %v168_v38, %v164_v35  ;;  %v80_v52 = vmul.u32 43690, %v75_v36 }
   0xf   :  { %549 = vmatpush.msra.mxu2 %v29_v5  ;;  %vm85_vm4 = vc.u32 %v77_v42, %v81_v43  ;;  %v167_v53 = vmul.u32 43690, %v162_v30  ;;  %v112_v54 = vshll.u32 %v675_v45, 16  ;;  %vm114_vm5 = vc.u32 %v106_v44, %v110_v47 }
  0x10   :  { %530 = vmatmul.msk.f32.vlgmr.msra.gmra.mxu2 %vm268_vm0, %v26_v9  ;;  %v116_v55 = vadd.s32 %v110_v47, %v106_v44  ;;  %v55_v56 = vshrl.u32 %v50_v20, 16  ;;  %v173_v57 = vsel %vm172_vm3, 1, %v570_v25  ;;  %v83_v58 = vshll.u32 %v79_v48, 16 }
  0x11   :  { %v64_v59 = vadd.s32 %v63_v49, %v53_v46  ;;  %vm176_vm6 = vc.u32 %v174_v51, %v170_v50  ;;  %v109_v60 = vmul.u32 43690, %v104_v39  ;;  %v86_v61 = vsel %vm85_vm4, 1, %v570_v25 }
  0x12   :  { %v115_v62 = vsel %vm114_vm5, 1, %v570_v25  ;;  %v87_v63 = vadd.s32 %v81_v43, %v77_v42  ;;  %v175_v0 = vadd.s32 %v173_v57, %v167_v53  ;;  %vm118_vm7 = vc.u32 %v116_v55, %v112_v54 }
  0x13   :  { %v88_v1 = vadd.s32 %v86_v61, %v80_v52  ;;  %v683_v2 = vadd.s32 40, %v649_v13  ;;  %v177_v3 = vsel %vm176_vm6, 1, %v570_v25  ;;  %v65_v4 = vadd.s32 %v64_v59, %v55_v56 }
  0x14   :  { %vm89_vm8 = vc.u32 %v87_v63, %v83_v58  ;;  %v117_v5 = vadd.s32 %v115_v62, %v109_v60  ;;  %v687_v6 = vadd.s32 24, %v649_v13  ;;  %v119_v7 = vsel %vm118_vm7, 1, %v570_v25 }
  0x15   :  { %v90_v8 = vsel %vm89_vm8, 1, %v570_v25  ;;  %v190_v9 = vand.u32 65535, %v683_v2  ;;  %v179_v12 = vadd.s32 %v177_v3, %v175_v0  ;;  %v82_v15 = vshrl.u32 %v666_v31, 16 }
  0x16   :  { %529 = vmatmul.msk.f32.gmra.mxu1 %vm268_vm0, %v25_v10  ;;  %532 = vmatmul.msk.f32.gmra.mxu3 %vm268_vm0, %v28_v11  ;;  %v191_v10 = vshrl.u32 %v683_v2, 16  ;;  %v169_v11 = vshrl.u32 %v165_v32, 16  ;;  %v92_v16 = vadd.s32 %v90_v8, %v88_v1  ;;  %v111_v17 = vshrl.u32 %v107_v40, 16 }
  0x17   :  { %v121_v18 = vadd.s32 %v119_v7, %v117_v5  ;;  %v194_v19 = vmul.u32 43690, %v190_v9  ;;  %v132_v21 = vand.u32 65535, %v687_v6  ;;  %v66_v23 = vshrl.u32 %v65_v4, 4 }
  0x18   :  { %v195_v20 = vmul.u32 43691, %v191_v10  ;;  %v84_v24 = vshrl.u32 %v79_v48, 16  ;;  %v171_v26 = vshrl.u32 %v670_v37, 16  ;;  %v180_v27 = vadd.s32 %v179_v12, %v169_v11 }
  0x19   :  { %v93_v28 = vadd.s32 %v92_v16, %v82_v15  ;;  %v193_v30 = vmul.u32 43691, %v190_v9  ;;  %v113_v33 = vshrl.u32 %v675_v45, 16  ;;  %v197_v32 = vshll.u32 %v194_v19, 16 }
  0x1a   :  { %v133_v34 = vshrl.u32 %v687_v6, 16  ;;  %v122_v31 = vadd.s32 %v121_v18, %v111_v17  ;;  %v196_v35 = vmul.u32 43690, %v191_v10  ;;  %v199_v36 = vshll.u32 %v195_v20, 16 }
  0x1b   :  { %v136_v38 = vmul.u32 43690, %v132_v21  ;;  %v67_v39 = vmul.u32 24, %v66_v23  ;;  %v181_v40 = vadd.s32 %v180_v27, %v171_v26  ;;  %v94_v41 = vadd.s32 %v93_v28, %v84_v24  ;;  %v340_v28 = vld [vmem:[%s875_s3] sm:$0xff] }
  0x1c   :  { %vm201_vm9 = vc.u32 %v193_v30, %v197_v32  ;;  %v203_v42 = vadd.s32 %v197_v32, %v193_v30  ;;  %v135_v37 = vmul.u32 43691, %v132_v21  ;;  %v137_v44 = vmul.u32 43691, %v133_v34 }
  0x1d   :  { %v202_v43 = vsel %vm201_vm9, 1, %v570_v25  ;;  %v139_v46 = vshll.u32 %v136_v38, 16  ;;  %v123_v47 = vadd.s32 %v122_v31, %v113_v33  ;;  %v198_v48 = vshrl.u32 %v194_v19, 16 }
  0x1e   :  { %v204_v45 = vadd.s32 %v202_v43, %v196_v35  ;;  %vm205_vm10 = vc.u32 %v203_v42, %v199_v36  ;;  %v138_v50 = vmul.u32 43690, %v133_v34  ;;  %v95_v51 = vshrl.u32 %v94_v41, 4 }
  0x1f   :  { %v206_v49 = vsel %vm205_vm10, 1, %v570_v25  ;;  %v200_v52 = vshrl.u32 %v195_v20, 16  ;;  %v182_v54 = vshrl.u32 %v181_v40, 4  ;;  %v141_v55 = vshll.u32 %v137_v44, 16  ;;  %v344_v40 = vld [vmem:[%s875_s3 + $0x20] sm:$0xff] }
  0x20   :  { %v208_v53 = vadd.s32 %v206_v49, %v204_v45  ;;  %vm143_vm11 = vc.u32 %v135_v37, %v139_v46  ;;  %v145_v56 = vadd.s32 %v139_v46, %v135_v37  ;;  %v68_v57 = vsub.s32 %v649_v13, %v67_v39  ;;  %v342_v45 = vld [vmem:[%s875_s3 + $0x10] sm:$0xff] }
  0x21   :  { %v124_v58 = vshrl.u32 %v123_v47, 4  ;;  %v144_v60 = vsel %vm143_vm11, 1, %v570_v25  ;;  %v140_v61 = vshrl.u32 %v136_v38, 16  ;;  %v96_v63 = vmul.u32 24, %v95_v51 }
  0x22   :  { %v209_v59 = vadd.s32 %v208_v53, %v198_v48  ;;  %v146_v62 = vadd.s32 %v144_v60, %v138_v50  ;;  %vm147_vm12 = vc.u32 %v145_v56, %v141_v55  ;;  %v183_v3 = vmul.u32 24, %v182_v54  ;;  %v345_v56 = vld [vmem:[%s875_s3 + $0x28] sm:$0xff] }
  0x23   :  { %v148_v1 = vsel %vm147_vm12, 1, %v570_v25  ;;  %v142_v4 = vshrl.u32 %v137_v44, 16  ;;  %vm216_vm13 = vcmp.ne.s32.totalorder %v68_v57, 0  ;;  %vm222_vm14 = vcmp.lt.s32.totalorder %v68_v57, 0  ;;  %v341_v44 = vld [vmem:[%s875_s3 + $0x8] sm:$0xff] }
  0x24   :  { %v210_v0 = vadd.s32 %v209_v59, %v200_v52  ;;  %v150_v5 = vadd.s32 %v148_v1, %v146_v62  ;;  %v125_v7 = vmul.u32 24, %v124_v58  ;;  %v234_v9 = vadd.s32 24, %v68_v57  ;;  %vm228_vm15 = vmand %vm222_vm14, %vm216_vm13  ;;  %v343_v58 = vld [vmem:[%s875_s3 + $0x18] sm:$0xff] }
  0x25   :  { %v97_v13 = vsub.s32 %v652_v14, %v96_v63  ;;  %v184_v11 = vsub.s32 %v658_v22, %v183_v3  ;;  %v711_v14 = vld [vmem:[%s873_s2] ss:$0 sm:$0xff]  ;;  %v571_v62 = vmov 128.0  }
  0x26   :  { %v151_v8 = vadd.s32 %v150_v5, %v140_v61  ;;  %v211_v10 = vshrl.u32 %v210_v0, 4  ;;  %v126_v15 = vsub.s32 %v663_v29, %v125_v7  ;;  %v706_v17 = vsel %vm228_vm15, %v234_v9, %v68_v57 }
  0x27   :  { %vm217_vm0 = vcmp.ne.s32.totalorder %v97_v13, 0  ;;  %vm223_vm1 = vcmp.lt.s32.totalorder %v97_v13, 0  ;;  %vm220_vm2 = vcmp.ne.s32.totalorder %v184_v11, 0  ;;  %vm226_vm3 = vcmp.lt.s32.totalorder %v184_v11, 0 }
  0x28   :  { %v152_v12 = vadd.s32 %v151_v8, %v142_v4  ;;  %v212_v25 = vmul.u32 24, %v211_v10  ;;  %vm218_vm4 = vcmp.ne.s32.totalorder %v126_v15, 0  ;;  %vm224_vm5 = vcmp.lt.s32.totalorder %v126_v15, 0  ;;  %vm229_vm8 = vmand %vm223_vm1, %vm217_vm0 }
  0x29   :  { %v235_v19 = vadd.s32 24, %v97_v13  ;;  %vm246_vm6 = vcmp.ge.s32.totalorder %v706_v17, 1  ;;  %vm252_vm7 = vcmp.lt.s32.totalorder %v706_v17, 17  ;;  %v238_v22 = vadd.s32 24, %v184_v11  ;;  %vm232_vm9 = vmand %vm226_vm3, %vm220_vm2 }
  0x2a   :  { %v153_v16 = vshrl.u32 %v152_v12, 4  ;;  %v236_v20 = vadd.s32 24, %v126_v15  ;;  %v213_v21 = vsub.s32 %v683_v2, %v212_v25  ;;  %vm230_vm10 = vmand %vm224_vm5, %vm218_vm4  ;;  %556 = vrcp.f32 %v571_v62 }
  0x2b   :  { %vm258_vm11 = vmand %vm246_vm6, %vm252_vm7  ;;  %v719_v24 = vsel %vm229_vm8, %v235_v19, %v97_v13  ;;  %v725_v30 = vsel %vm232_vm9, %v238_v22, %v184_v11 }
  0x2c   :  { %v154_v18 = vmul.u32 24, %v153_v16  ;;  %vm221_vm14 = vcmp.ne.s32.totalorder %v213_v21, 0  ;;  %vm227_vm15 = vcmp.lt.s32.totalorder %v213_v21, 0  ;;  %vm247_vm0 = vcmp.ge.s32.totalorder %v719_v24, 1 }
  0x2d   :  { %vm253_vm1 = vcmp.lt.s32.totalorder %v719_v24, 17  ;;  %vm250_vm2 = vcmp.ge.s32.totalorder %v725_v30, 1  ;;  %vm256_vm3 = vcmp.lt.s32.totalorder %v725_v30, 17  ;;  %v239_v34 = vadd.s32 24, %v213_v21  ;;  %vm233_vm5 = vmand %vm227_vm15, %vm221_vm14 }
  0x2e   :  { %v155_v29 = vsub.s32 %v687_v6, %v154_v18  ;;  %v727_v6 = vsel %vm230_vm10, %v236_v20, %v126_v15  ;;  %vm738_vm9 = vmand %vm247_vm0, %vm253_vm1 }
  0x2f   :  { %vm248_vm6 = vcmp.ge.s32.totalorder %v727_v6, 1  ;;  %vm254_vm8 = vcmp.lt.s32.totalorder %v727_v6, 17  ;;  %vm262_vm10 = vmand %vm250_vm2, %vm256_vm3  ;;  %v750_v41 = vsel %vm233_vm5, %v239_v34, %v213_v21 }
  0x30   :  { %vm219_vm12 = vcmp.ne.s32.totalorder %v155_v29, 0  ;;  %vm225_vm13 = vcmp.lt.s32.totalorder %v155_v29, 0  ;;  %v237_v33 = vadd.s32 24, %v155_v29  ;;  %vm251_vm14 = vcmp.ge.s32.totalorder %v750_v41, 1  ;;  %v557_v63 = vpop.eup %556 }
  0x31   :  { %vm231_vm4 = vmand %vm225_vm13, %vm219_vm12  ;;  %vm257_vm15 = vcmp.lt.s32.totalorder %v750_v41, 17  ;;  %v367_v0 = vmul.f32 128.0, %v557_v63 }
  0x32   :  { %v744_v38 = vsel %vm231_vm4, %v237_v33, %v155_v29  ;;  %vm263_vm2 = vmand %vm251_vm14, %vm257_vm15  ;;  %vm371_vm4 = vweird.f32 %v557_v63 }
  0x33   :  { %vm249_vm12 = vcmp.ge.s32.totalorder %v744_v38, 1  ;;  %vm255_vm13 = vcmp.lt.s32.totalorder %v744_v38, 17  ;;  %v368_v1 = vsub.f32 1.0, %v367_v0 }
  0x34   :  { %vm261_vm0 = vmand %vm249_vm12, %vm255_vm13 }
  0x35   :  { %v369_v3 = vmul.f32 %v557_v63, %v368_v1  ;;  %v820_v1 = vld [vmem:[%s877_s5] ss:$0 sm:$0xff] }
  0x37   :  { %v370_v4 = vadd.f32 %v557_v63, %v369_v3 }
  0x39   :  { %v372_v5 = vsel %vm371_vm4, %v557_v63, %v370_v4 }
  0x8a   :  { %v304_v23 = vpop.f32.mrf.mxu0 }
  0x8b   :  { %v305_v26 = vadd.f32 %v711_v14, %v304_v23  ;;  %v307_v27 = vpop.f32.mrf.mxu1 }
  0x8c   :  { %v308_v31 = vadd.f32 %v711_v14, %v307_v27 }
  0x8d   :  { %v334_v2 = vsel %vm258_vm11, %v305_v26, 0.0  ;;  %vm754_vm11 = vmand %vm248_vm6, %vm254_vm8 }
  0x8e   :  { %v346_v32 = vadd.f32 %v340_v28, %v334_v2  ;;  %v335_v37 = vsel %vm738_vm9, %v308_v31, 0.0 }
  0x8f   :  { %v347_v51 = vadd.f32 %v341_v44, %v335_v37 }
  0x90   :  { %354 = vadd.xlane.f32.xlu0 %v346_v32 }
  0x91   :  { %v316_v36 = vpop.f32.mrf.mxu3 }
  0x92   :  { %v317_v39 = vadd.f32 %v711_v14, %v316_v36 }
  0x93   :  { %v310_v42 = vpop.f32.mrf.mxu1  ;;  %v313_v46 = vpop.f32.mrf.mxu2 }
  0x94   :  { %v311_v47 = vadd.f32 %v711_v14, %v310_v42  ;;  %v338_v48 = vsel %vm262_vm10, %v317_v39, 0.0  ;;  %v314_v52 = vadd.f32 %v711_v14, %v313_v46 }
  0x95   :  { %v350_v49 = vadd.f32 %v344_v40, %v338_v48 }
  0x96   :  { %v336_v50 = vsel %vm754_vm11, %v311_v47, 0.0  ;;  %v337_v57 = vsel %vm261_vm0, %v314_v52, 0.0 }
  0x97   :  { %362 = vadd.xlane.f32.xlu2 %v350_v49  ;;  %v348_v53 = vadd.f32 %v342_v45, %v336_v50  ;;  %v349_v61 = vadd.f32 %v343_v58, %v337_v57 }
  0x98   :  { %356 = vadd.xlane.f32.xlu0 %v347_v51 }
  0x99   :  { %v319_v54 = vpop.f32.mrf.mxu3  ;;  %358 = vadd.xlane.f32.xlu1 %v348_v53 }
  0x9a   :  { %v320_v55 = vadd.f32 %v711_v14, %v319_v54 }
  0x9c   :  { %v339_v59 = vsel %vm263_vm2, %v320_v55, 0.0 }
  0x9d   :  { %v351_v60 = vadd.f32 %v345_v56, %v339_v59 }
  0x9f   :  { %364 = vadd.xlane.f32.xlu2 %v351_v60 }
  0xa1   :  { %360 = vadd.xlane.f32.xlu1 %v349_v61 }
 0x103   :  { %v355_v7 = vpop.xlane.xlu0 %354 }
 0x104   :  { %v373_v8 = vmul.f32 %v372_v5, %v355_v7 }
 0x106   :  { %v785_v9 = vsub.f32 %v346_v32, %v373_v8 }
 0x108   :  { %v385_v13 = vmul.f32 %v785_v9, %v785_v9 }
 0x10a   :  { %v363_v10 = vpop.xlane.xlu2 %362  ;;  %391 = vadd.xlane.f32.xlu0 %v385_v13 }
 0x10b   :  { %v357_v11 = vpop.xlane.xlu0 %356  ;;  %v377_v19 = vmul.f32 %v372_v5, %v363_v10 }
 0x10c   :  { %v359_v12 = vpop.xlane.xlu1 %358  ;;  %v374_v15 = vmul.f32 %v372_v5, %v357_v11 }
 0x10d   :  { %v375_v16 = vmul.f32 %v372_v5, %v359_v12  ;;  %v797_v21 = vsub.f32 %v350_v49, %v377_v19 }
 0x10e   :  { %v789_v25 = vsub.f32 %v347_v51, %v374_v15 }
 0x10f   :  { %v791_v18 = vsub.f32 %v348_v53, %v375_v16  ;;  %v389_v2 = vmul.f32 %v797_v21, %v797_v21 }
 0x110   :  { %v386_v14 = vmul.f32 %v789_v25, %v789_v25 }
 0x111   :  { %v387_v22 = vmul.f32 %v791_v18, %v791_v18 }
 0x112   :  { %v365_v29 = vpop.xlane.xlu2 %364  ;;  %393 = vadd.xlane.f32.xlu1 %v386_v14 }
 0x113   :  { %v378_v20 = vmul.f32 %v372_v5, %v365_v29  ;;  %395 = vadd.xlane.f32.xlu2 %v387_v22 }
 0x114   :  { %v361_v23 = vpop.xlane.xlu1 %360 }
 0x115   :  { %v799_v26 = vsub.f32 %v351_v60, %v378_v20  ;;  %v376_v27 = vmul.f32 %v372_v5, %v361_v23 }
 0x117   :  { %v801_v28 = vsub.f32 %v349_v61, %v376_v27  ;;  %v390_v33 = vmul.f32 %v799_v26, %v799_v26  ;;  %v814_v61 = vld [vmem:[%s876_s4] ss:$0 sm:$0xff] }
 0x119   :  { %v388_v32 = vmul.f32 %v801_v28, %v801_v28 }
 0x11a   :  { %399 = vadd.xlane.f32.xlu1 %v389_v2 }
 0x11b   :  { %401 = vadd.xlane.f32.xlu2 %v390_v33  ;;  %397 = vadd.xlane.f32.xlu0 %v388_v32 }
 0x17d   :  { %v392_v34 = vpop.xlane.xlu0 %391 }
 0x17e   :  { %v403_v31 = vmul.f32 %v392_v34, %v372_v5 }
 0x180   :  { %v409_v35 = vadd.f32 1e-05, %v403_v31 }
 0x182   :  { %558 = vrsqrt.f32 %v409_v35  ;;  %vm421_vm6 = vweird.f32 %v409_v35 }
 0x185   :  { %v394_v36 = vpop.xlane.xlu1 %393 }
 0x186   :  { %v396_v39 = vpop.xlane.xlu2 %395  ;;  %v404_v40 = vmul.f32 %v394_v36, %v372_v5 }
 0x187   :  { %v405_v42 = vmul.f32 %v396_v39, %v372_v5 }
 0x188   :  { %v559_v43 = vpop.eup %558  ;;  %v410_v37 = vadd.f32 1e-05, %v404_v40 }
 0x189   :  { %v416_v44 = vmul.f32 %v559_v43, %v409_v35  ;;  %v411_v46 = vadd.f32 1e-05, %v405_v42  ;;  %vm422_vm5 = vweird.f32 %v559_v43 }
 0x18a   :  { %560 = vrsqrt.f32 %v410_v37  ;;  %vm423_vm9 = vmor %vm421_vm6, %vm422_vm5  ;;  %vm431_vm12 = vweird.f32 %v410_v37 }
 0x18b   :  { %v417_v47 = vmul.f32 %v559_v43, %v416_v44  ;;  %562 = vrsqrt.f32 %v411_v46  ;;  %vm441_vm14 = vweird.f32 %v411_v46 }
 0x18d   :  { %v418_v48 = vmul.f32 0.5, %v417_v47  ;;  %v400_v45 = vpop.xlane.xlu1 %399 }
 0x18e   :  { %v402_v49 = vpop.xlane.xlu2 %401  ;;  %v407_v50 = vmul.f32 %v400_v45, %v372_v5  ;;  %v398_v51 = vpop.xlane.xlu0 %397 }
 0x18f   :  { %v419_v52 = vsub.f32 1.5, %v418_v48  ;;  %v408_v53 = vmul.f32 %v402_v49, %v372_v5  ;;  %v406_v56 = vmul.f32 %v398_v51, %v372_v5 }
 0x190   :  { %v561_v54 = vpop.eup %560  ;;  %v809_v55 = vadd.f32 1e-05, %v407_v50 }
 0x191   :  { %v563_v57 = vpop.eup %562  ;;  %v420_v58 = vmul.f32 %v559_v43, %v419_v52  ;;  %v426_v59 = vmul.f32 %v561_v54, %v410_v37  ;;  %v414_v60 = vadd.f32 1e-05, %v408_v53  ;;  %v412_v5 = vadd.f32 1e-05, %v406_v56 }
 0x192   :  { %v436_v62 = vmul.f32 %v563_v57, %v411_v46  ;;  %564 = vrsqrt.f32 %v809_v55  ;;  %vm432_vm10 = vweird.f32 %v561_v54  ;;  %vm442_vm11 = vweird.f32 %v563_v57 }
 0x193   :  { %v424_v63 = vsel %vm423_vm9, %v559_v43, %v420_v58  ;;  %v427_v0 = vmul.f32 %v561_v54, %v426_v59  ;;  %566 = vrsqrt.f32 %v414_v60  ;;  %vm433_vm0 = vmor %vm431_vm12, %vm432_vm10  ;;  %vm461_vm5 = vweird.f32 %v809_v55 }
 0x194   :  { %v475_v3 = vmul.f32 %v424_v63, %v785_v9  ;;  %v437_v4 = vmul.f32 %v563_v57, %v436_v62  ;;  %568 = vrsqrt.f32 %v412_v5  ;;  %vm443_vm2 = vmor %vm441_vm14, %vm442_vm11  ;;  %vm471_vm6 = vweird.f32 %v414_v60 }
 0x195   :  { %v428_v7 = vmul.f32 0.5, %v427_v0 }
 0x196   :  { %v484_v8 = vmul.f32 %v814_v61, %v475_v3  ;;  %v438_v13 = vmul.f32 0.5, %v437_v4 }
 0x197   :  { %v429_v10 = vsub.f32 1.5, %v428_v7 }
 0x198   :  { %v565_v11 = vpop.eup %564  ;;  %v493_v12 = vadd.f32 %v820_v1, %v484_v8  ;;  %v439_v15 = vsub.f32 1.5, %v438_v13 }
 0x199   :  { %v567_v16 = vpop.eup %566  ;;  %v430_v19 = vmul.f32 %v561_v54, %v429_v10  ;;  %v456_v14 = vmul.f32 %v565_v11, %v809_v55 }
 0x19a   :  { %v511_v9 = vsel %vm252_vm7, %v493_v12, 0.0  ;;  %v440_v22 = vmul.f32 %v563_v57, %v439_v15  ;;  %v466_v29 = vmul.f32 %v567_v16, %v414_v60  ;;  %v569_v27 = vpop.eup %568  ;;  %vm462_vm7 = vweird.f32 %v565_v11 }
 0x19b   :  { %517 = vst [vmem:[%s878_s6] sm:$0xff] %v511_v9  ;;  %v434_v20 = vsel %vm433_vm0, %v561_v54, %v430_v19  ;;  %v457_v23 = vmul.f32 %v565_v11, %v456_v14  ;;  %v446_v31 = vmul.f32 %v569_v27, %v412_v5  ;;  %vm472_vm4 = vweird.f32 %v567_v16  ;;  %vm463_vm9 = vmor %vm461_vm5, %vm462_vm7 }
 0x19c   :  { %v444_v2 = vsel %vm443_vm2, %v563_v57, %v440_v22  ;;  %v476_v33 = vmul.f32 %v434_v20, %v789_v25  ;;  %v467_v32 = vmul.f32 %v567_v16, %v466_v29  ;;  %vm473_vm10 = vmor %vm471_vm6, %vm472_vm4  ;;  %vm452_vm11 = vweird.f32 %v569_v27 }
 0x19d   :  { %v477_v34 = vmul.f32 %v444_v2, %v791_v18  ;;  %v458_v17 = vmul.f32 0.5, %v457_v23  ;;  %v447_v42 = vmul.f32 %v569_v27, %v446_v31 }
 0x19e   :  { %v485_v35 = vmul.f32 %v814_v61, %v476_v33  ;;  %v468_v36 = vmul.f32 0.5, %v467_v32 }
 0x19f   :  { %v486_v39 = vmul.f32 %v814_v61, %v477_v34  ;;  %v459_v40 = vsub.f32 1.5, %v458_v17  ;;  %v448_v18 = vmul.f32 0.5, %v447_v42 }
 0x1a0   :  { %v494_v43 = vadd.f32 %v820_v1, %v485_v35  ;;  %v469_v37 = vsub.f32 1.5, %v468_v36 }
 0x1a1   :  { %v495_v44 = vadd.f32 %v820_v1, %v486_v39  ;;  %v460_v25 = vmul.f32 %v565_v11, %v459_v40  ;;  %v449_v49 = vsub.f32 1.5, %v448_v18 }
 0x1a2   :  { %v512_v46 = vsel %vm253_vm1, %v494_v43, 0.0  ;;  %v470_v47 = vmul.f32 %v567_v16, %v469_v37  ;;  %vm451_vm1 = vweird.f32 %v412_v5 }
 0x1a3   :  { %v513_v48 = vsel %vm254_vm8, %v495_v44, 0.0  ;;  %518 = vst [vmem:[%s878_s6 + $0x8] sm:$0xff] %v512_v46  ;;  %v464_v45 = vsel %vm463_vm9, %v565_v11, %v460_v25  ;;  %v450_v52 = vmul.f32 %v569_v27, %v449_v49  ;;  %vm453_vm8 = vmor %vm451_vm1, %vm452_vm11 }
 0x1a4   :  { %519 = vst [vmem:[%s878_s6 + $0x10] sm:$0xff] %v513_v48  ;;  %v474_v24 = vsel %vm473_vm10, %v567_v16, %v470_v47  ;;  %v479_v50 = vmul.f32 %v464_v45, %v797_v21 }
 0x1a5   :  { %v480_v51 = vmul.f32 %v474_v24, %v799_v26  ;;  %v454_v54 = vsel %vm453_vm8, %v569_v27, %v450_v52 }
 0x1a6   :  { %v488_v6 = vmul.f32 %v814_v61, %v479_v50  ;;  %v478_v56 = vmul.f32 %v454_v54, %v801_v28 }
 0x1a7   :  { %v489_v53 = vmul.f32 %v814_v61, %v480_v51 }
 0x1a8   :  { %v497_v55 = vadd.f32 %v820_v1, %v488_v6  ;;  %v487_v21 = vmul.f32 %v814_v61, %v478_v56 }
 0x1a9   :  { %v498_v57 = vadd.f32 %v820_v1, %v489_v53 }
 0x1aa   :  { %v515_v58 = vsel %vm256_vm3, %v497_v55, 0.0  ;;  %v496_v28 = vadd.f32 %v820_v1, %v487_v21 }
 0x1ab   :  { %v516_v26 = vsel %vm257_vm15, %v498_v57, 0.0  ;;  %521 = vst [vmem:[%s878_s6 + $0x20] sm:$0xff] %v515_v58 }
 0x1ac   :  { %522 = vst [vmem:[%s878_s6 + $0x28] sm:$0xff] %v516_v26  ;;  %v514_v59 = vsel %vm255_vm13, %v496_v28, 0.0 }
 0x1ad   :  { %520 = vst [vmem:[%s878_s6 + $0x18] sm:$0xff] %v514_v59 }

// kernel: _lambda_.3
= control target key start
LH: loop header
LB: loop body
LE: loop exit
PB: predicated region body
PF: predicated region fallthrough
CT: control target
= control target key end

     0   :  { %s2954_s0 = inlined_call_operand.vmem [shape: f32[48,128], index: 0, kind: input, shape index: {}]   ;;  %s2955_s1 = inlined_call_operand.vmem [shape: f32[2,8,512], index: 1, kind: input, shape index: {}]   ;;  %s2956_s2 = inlined_call_operand.hbm [shape: f32[2,128,384], index: 2, kind: input, shape index: {}]   ;;  %s2957_s3 = inlined_call_operand.hbm [shape: f32[2,128,128], index: 3, kind: input, shape index: {}]   ;;  %s2958_s4 = inlined_call_operand.vmem [shape: f32[2,128,512], index: 4, kind: input, shape index: {}]   ;;  %s2959_s5 = inlined_call_operand.vmem [shape: f32[2,512,128], index: 5, kind: input, shape index: {}]   ;;  %s2960_s6 = inlined_call_operand.vmem [shape: f32[48,128], index: 6, kind: output, shape index: {}]  }
   0x1   :  { %2963 = sst [smem:[#allocation12_spill]] %s2956_s2 }
   0x2   :  { %11 = vsyncpa [#allocation3], 0 }
   0x3   :  { %13 = vsyncpa [#allocation3 + $0x1], 0 }
   0x4   :  { %14 = vsyncpa [#allocation5], 0 }
   0x5   :  { %16 = vsyncpa [#allocation5 + $0x1], 0  ;;  %s2211_s21 = smov 0   ;;  %s2213_s22 = smov 0  }
   0x6   :  { %s2215_s23 = smov 0   ;;  %s2217_s24 = smov 0  }
   0x7   :  { %s2219_s25 = smov 0   ;;  %s2221_s26 = smov 0  }
   0x8   :  { %s2223_s27 = smov 0   ;;  %s2225_s28 = smov 0  }
   0x9 LB: > { %2964 = sst [smem:[#allocation8_spill]] %s2164_s27  ;;  %s1800_s29 = sadd.s32 4294967295, %s2168_s28   ;;  %s2168_s28 = sphi %s2225_s28, %s22_s28   ;;  %s2164_s27 = sphi %s2223_s27, %s2986_s27   ;;  %s2160_s26 = sphi %s2221_s26, %s2991_s26   ;;  %s2156_s25 = sphi %s2219_s25, %s2984_s25   ;;  %s2152_s24 = sphi %s2217_s24, %s2990_s24   ;;  %s2148_s23 = sphi %s2215_s23, %s2989_s23   ;;  %s2144_s22 = sphi %s2213_s22, %s2988_s22   ;;  %s2140_s21 = sphi %s2211_s21, %s2987_s21  }
   0xa   : > { %s31_s30 = sadd.s32 1, %s2160_s26  ;;  %s34_s7 = sadd.s32 1, %s2164_s27 }
   0xb   : > { %p32_p0 = scmp.ge.s32.totalorder %s31_s30, 2  ;;  %s93_s8 = sadd.s32 1, %s2148_s23 }
   0xc   : > { %p100_p1 = scmp.ne.s32.totalorder %s2148_s23, %s2144_s22  ;;  %p101_p2 = scmp.eq.s32.totalorder %s2168_s28, 0 }
   0xd   : > { %s2993_s30 = smov (%p32_p0, %s31_s30), 0  ;;  %s2995_s7 = smov (!%p32_p0, %s34_s7), %s2164_s27 }
   0xe   : > { %2965 = sst [smem:[#allocation9_spill]] %s2993_s30  ;;  %s90_s9 = ssub.s32 %s2160_s26, %s2993_s30 }
   0xf   : > { %p36_p3 = scmp.ge.s32.totalorder %s2995_s7, 2  ;;  %p91_p4 = scmp.eq.s32.totalorder %s90_s9, 0 }
  0x10   : > { %p102_p5 = por %p101_p2, %p100_p1  ;;  %p106_p6 = scmp.ne.s32.totalorder %s2144_s22, %s2140_s21 }
  0x11   : > { %s2997_s7 = smov (%p36_p3, %s2995_s7), 0  ;;  %p107_p7 = scmp.eq.s32.totalorder %s1800_s29, 0 }
  0x12   : > { %2966 = sst [smem:[#allocation10_spill]] %s2997_s7  ;;  %p1875_p8 = scmp.lt.s32.totalorder %s2168_s28, 4 }
  0x13   : > { %s2265_s10 = scalar_select %p91_p4, %s2148_s23, %s93_s8  }
  0x14   : > { %s2269_s11 = sand.u32 1, %s2148_s23   ;;  %p2271_p9 = por %p107_p7, %p106_p6 }
  0x15   : > { %2967 = sst [smem:[#allocation11_spill]] %s2265_s10  ;;  %s1861_s13 = smul.u32 384, %s2269_s11 }
  0x16   : > { %p2276_p10 = pnand %p1875_p8, %p102_p5  ;;  %s1862_s15 = smul.u32 384, %s2160_s26 }
  0x17   : > { %s2970_s2 = sld [smem:[#allocation12_spill]]  ;;  %s255_s19 = scalar_lea.vmem [#allocation2], %s1861_s13 }
  0x18   : > { %s263_s20 = sshll.u32 %s255_s19, 4  ;;  %s252_s29 = scalar_lea.sflag [#allocation3], %s2269_s11  ;;  %s264_s20 = int_to_ptr.vmem [resolvable:$true] %s263_s20 }
  0x19   : > { %s2170_s8 = smov 384   ;;  %s2171_s9 = smov 24  }
  0x1a   : > { %p1808_p11 = scmp.ge.s32.totalorder %s2168_s28, 1  ;;  %p309_p12 = scmp.lt.s32.totalorder %s2168_s28, 5 }
  0x1b   : > { %s1805_s7 = sshll.u32 %s2269_s11, 7  ;;  %s1857_s30 = sshll.u32 %s2160_s26, 7 }
  0x1c   : > { %p310_p13 = pnand %p1808_p11, %p309_p12  ;;  %s277_s27 = scalar_lea.vmem [#allocation4], %s1805_s7 }
  0x1d   : > { %s260_s18 = scalar_lea.hbm %s2970_s2, %s1862_s15  ;;  %s285_s16 = sshll.u32 %s277_s27, 4  ;;  %s286_s16 = int_to_ptr.vmem [resolvable:$true] %s285_s16 }
  0x1e   : > { %s261_s21 = sshll.u32 %s260_s18, 4  ;;  %s282_s17 = scalar_lea.hbm %s2957_s3, %s1857_s30  ;;  %s262_s21 = int_to_ptr.hbm [resolvable:$true] %s261_s21 }
  0x1f   : > { %1871 = dma.hbm_to_vmem [thread:$0]  (!%p2276_p10), %s262_s21, 6144, %s264_s20, %s252_s29, %s2170_s8, %s2170_s8, %s2171_s9  }
  0x20   : > { %s283_s18 = sshll.u32 %s282_s17, 4  ;;  %s274_s19 = scalar_lea.sflag [#allocation5], %s2269_s11  ;;  %s284_s18 = int_to_ptr.hbm [resolvable:$true] %s283_s18 }
  0x21   : > { %s2172_s2 = smov 128   ;;  %s2173_s10 = smov 8  }
  0x22   : > { %1874 = dma.hbm_to_vmem [thread:$0]  (!%p2276_p10), %s284_s18, 2048, %s286_s16, %s274_s19, %s2172_s2, %s2172_s2, %s2173_s10  }
  0x23   : > { %313 = sbr.rel (%p310_p13) target bundleno = 1860 (0x744), region = 44  ;;  %s315_s20 = sand.u32 (!%p310_p13), 1, %s2144_s22  }
  0x24   : > { %s1863_s21 = smul.u32 (!%p310_p13), 384, %s315_s20  ;;  %s316_s29 = scalar_lea.sflag (!%p310_p13), [#allocation3], %s315_s20 }
  0x26   : > { %s2298_s7 = scalar_lea.vmem (!%p310_p13), [#allocation2], %s1863_s21 }
  0x28   : > { %2131 = dma.done.wait (%p2271_p9), %s316_s29, 6144  }
  0x29   : > { %2133 = vsyncadd (%p2271_p9), %s316_s29, 4294961152  ;;  %s1809_s27 = sshll.u32 %s315_s20, 7  ;;  %s326_s30 = scalar_lea.sflag [#allocation5], %s315_s20 }
  0x2a   : > { %s2304_s11 = scalar_lea.vmem [#allocation4], %s1809_s27 }
  0x2b   : > { %2135 = dma.done.wait (%p2271_p9), %s326_s30, 2048  }
  0x2c   : > { %2137 = vsyncadd (%p2271_p9), %s326_s30, 4294965248  ;;  %s384_s2 = smul.u32 3, %s2156_s25  ;;  %p390_p0 = scmp.lt.s32.totalorder %s2152_s24, 1 }
  0x2d   : > { %p1818_p2 = scmp.ne.s32.totalorder %s2152_s24, 0 }
  0x2e   : > { %p385_p1 = scmp.lt.s32.totalorder %s384_s2, 5 }
  0x2f   : > { %s391_s10 = scalar_select %p390_p0, %s2152_s24, 1 }
  0x30   : > { %s2999_s2 = smov (!%p385_p1, %s384_s2), 5  ;;  %414 = sbr.rel (%p1818_p2) target bundleno = 57 (0x39), region = 56 }
  0x31   : > { %s1858_s14 = sshll.u32 %s391_s10, 5  ;;  %s1859_s8 = sshll.u32 %s391_s10, 9 }
  0x32   : > { %s1810_s9 = sshll.u32 %s2999_s2, 3  ;;  %s2316_s13 = scalar_lea.vmem %s2955_s1, %s1858_s14 }
  0x33   : > { %s388_s12 = scalar_lea.vmem %s2954_s0, %s1810_s9  ;;  %s2324_s25 = scalar_lea.vmem %s2958_s4, %s1859_s8 }
  0x34   : > { %s2329_s27 = scalar_lea.vmem %s2959_s5, %s1859_s8  ;;  %s2334_s10 = scalar_lea.vmem %s2960_s6, %s1810_s9 }
  0x35   : > { %v415_v0 = vld [vmem:[%s388_s12] sm:$0xff]  ;;  %v416_v1 = vld [vmem:[%s388_s12 + $0x8] sm:$0xff]  ;;  %v417_v2 = vld [vmem:[%s388_s12 + $0x10] sm:$0xff] }
  0x36   : > { %418 = vst [vmem:[%s2334_s10] sm:$0xff] %v415_v0 }
  0x37   : > { %419 = vst [vmem:[%s2334_s10 + $0x8] sm:$0xff] %v416_v1 }
  0x38   : > { %420 = vst [vmem:[%s2334_s10 + $0x10] sm:$0xff] %v417_v2 }
  0x39 PF: > { %v2174_v6 = vmov 128.0   ;;  %v548_v11 = vld [vmem:[%s2298_s7 + $0x168] sm:$0xff]  ;;  %v549_v12 = vld [vmem:[%s2298_s7 + $0x170] sm:$0xff]  ;;  %v550_v13 = vld [vmem:[%s2298_s7 + $0x178] sm:$0xff]  ;;  %s2175_s24 = smov 64   ;;  %vm654_vm10 = vcmask 523264  }
  0x3a   : > { %1951 = vrcp.f32 %v2174_v6  ;;  %554 = vmatpush.msra.mxu0 %v548_v11  ;;  %580 = vmatpush.msra.mxu1 %v549_v12  ;;  %v545_v14 = vld [vmem:[%s2298_s7 + $0x150] sm:$0xff]  ;;  %v546_v15 = vld [vmem:[%s2298_s7 + $0x158] sm:$0xff]  ;;  %v547_v16 = vld [vmem:[%s2298_s7 + $0x160] sm:$0xff]  ;;  %vm704_vm12 = vcmask 195584  }
  0x3b   : > { %606 = vmatpush.msra.mxu2 %v550_v13  ;;  %v542_v31 = vld [vmem:[%s2298_s7 + $0x138] sm:$0xff]  ;;  %v543_v32 = vld [vmem:[%s2298_s7 + $0x140] sm:$0xff]  ;;  %v544_v33 = vld [vmem:[%s2298_s7 + $0x148] sm:$0xff] }
  0x3c   : > { %555 = vmatpush.msra.mxu0 %v545_v14  ;;  %581 = vmatpush.msra.mxu1 %v546_v15  ;;  %v539_v34 = vld [vmem:[%s2298_s7 + $0x120] sm:$0xff]  ;;  %v540_v35 = vld [vmem:[%s2298_s7 + $0x128] sm:$0xff]  ;;  %v541_v36 = vld [vmem:[%s2298_s7 + $0x130] sm:$0xff] }
  0x3d   : > { %v2341_v3 = vld [vmem:[%s2334_s10] sm:$0xff]  ;;  %607 = vmatpush.msra.mxu2 %v547_v16  ;;  %v536_v37 = vld [vmem:[%s2298_s7 + $0x108] sm:$0xff]  ;;  %v537_v38 = vld [vmem:[%s2298_s7 + $0x110] sm:$0xff] }
  0x3e   : > { %428 = vadd.xlane.f32.xlu0 %v2341_v3  ;;  %v2349_v5 = vld [vmem:[%s2334_s10 + $0x8] sm:$0xff]  ;;  %556 = vmatpush.msra.mxu0 %v542_v31  ;;  %v538_v39 = vld [vmem:[%s2298_s7 + $0x118] sm:$0xff]  ;;  %v533_v40 = vld [vmem:[%s2298_s7 + $0xf0] sm:$0xff] }
  0x3f   : > { %v2344_v4 = vld [vmem:[%s2334_s10 + $0x10] sm:$0xff]  ;;  %582 = vmatpush.msra.mxu1 %v543_v32  ;;  %608 = vmatpush.msra.mxu2 %v544_v33  ;;  %v534_v41 = vld [vmem:[%s2298_s7 + $0xf8] sm:$0xff]  ;;  %v535_v42 = vld [vmem:[%s2298_s7 + $0x100] sm:$0xff] }
  0x40   : > { %432 = vadd.xlane.f32.xlu1 %v2344_v4  ;;  %v1952_v7 = vpop.eup %1951  ;;  %557 = vmatpush.msra.mxu0 %v539_v34  ;;  %v530_v43 = vld [vmem:[%s2298_s7 + $0xd8] sm:$0xff]  ;;  %v531_v44 = vld [vmem:[%s2298_s7 + $0xe0] sm:$0xff]  ;;  %v532_v45 = vld [vmem:[%s2298_s7 + $0xe8] sm:$0xff] }
  0x41   : > { %v435_v8 = vmul.f32 128.0, %v1952_v7  ;;  %vm439_vm0 = vweird.f32 %v1952_v7  ;;  %583 = vmatpush.msra.mxu1 %v540_v35  ;;  %609 = vmatpush.msra.mxu2 %v541_v36  ;;  %v527_v46 = vld [vmem:[%s2298_s7 + $0xc0] sm:$0xff]  ;;  %v528_v47 = vld [vmem:[%s2298_s7 + $0xc8] sm:$0xff]  ;;  %v529_v48 = vld [vmem:[%s2298_s7 + $0xd0] sm:$0xff] }
  0x42   : > { %558 = vmatpush.msra.mxu0 %v536_v37  ;;  %v524_v49 = vld [vmem:[%s2298_s7 + $0xa8] sm:$0xff]  ;;  %v525_v50 = vld [vmem:[%s2298_s7 + $0xb0] sm:$0xff]  ;;  %v526_v51 = vld [vmem:[%s2298_s7 + $0xb8] sm:$0xff] }
  0x43   : > { %v436_v9 = vsub.f32 1.0, %v435_v8  ;;  %584 = vmatpush.msra.mxu1 %v537_v38  ;;  %610 = vmatpush.msra.mxu2 %v538_v39  ;;  %v521_v52 = vld [vmem:[%s2298_s7 + $0x90] sm:$0xff]  ;;  %v522_v53 = vld [vmem:[%s2298_s7 + $0x98] sm:$0xff]  ;;  %v523_v54 = vld [vmem:[%s2298_s7 + $0xa0] sm:$0xff] }
  0x44   : > { %559 = vmatpush.msra.mxu0 %v533_v40  ;;  %v518_v55 = vld [vmem:[%s2298_s7 + $0x78] sm:$0xff]  ;;  %v519_v56 = vld [vmem:[%s2298_s7 + $0x80] sm:$0xff]  ;;  %v520_v57 = vld [vmem:[%s2298_s7 + $0x88] sm:$0xff] }
  0x45   : > { %v437_v10 = vmul.f32 %v1952_v7, %v436_v9  ;;  %585 = vmatpush.msra.mxu1 %v534_v41  ;;  %611 = vmatpush.msra.mxu2 %v535_v42  ;;  %v515_v58 = vld [vmem:[%s2298_s7 + $0x60] sm:$0xff]  ;;  %v516_v59 = vld [vmem:[%s2298_s7 + $0x68] sm:$0xff]  ;;  %v517_v60 = vld [vmem:[%s2298_s7 + $0x70] sm:$0xff] }
  0x46   : > { %430 = vadd.xlane.f32.xlu0 %v2349_v5  ;;  %560 = vmatpush.msra.mxu0 %v530_v43  ;;  %v512_v61 = vld [vmem:[%s2298_s7 + $0x48] sm:$0xff]  ;;  %v513_v62 = vld [vmem:[%s2298_s7 + $0x50] sm:$0xff]  ;;  %v514_v63 = vld [vmem:[%s2298_s7 + $0x58] sm:$0xff] }
  0x47   : > { %v438_v17 = vadd.f32 %v1952_v7, %v437_v10  ;;  %586 = vmatpush.msra.mxu1 %v531_v44  ;;  %612 = vmatpush.msra.mxu2 %v532_v45  ;;  %v509_v0 = vld [vmem:[%s2298_s7 + $0x30] sm:$0xff]  ;;  %v510_v1 = vld [vmem:[%s2298_s7 + $0x38] sm:$0xff]  ;;  %v511_v2 = vld [vmem:[%s2298_s7 + $0x40] sm:$0xff] }
  0x48   : > { %561 = vmatpush.msra.mxu0 %v527_v46  ;;  %v506_v6 = vld [vmem:[%s2298_s7 + $0x18] sm:$0xff]  ;;  %v508_v8 = vld [vmem:[%s2298_s7 + $0x28] sm:$0xff]  ;;  %v503_v9 = vld [vmem:[%s2298_s7] sm:$0xff] }
  0x49   : > { %v2358_v18 = vsel %vm439_vm0, %v1952_v7, %v438_v17  ;;  %587 = vmatpush.msra.mxu1 %v528_v47  ;;  %613 = vmatpush.msra.mxu2 %v529_v48  ;;  %v507_v7 = vld [vmem:[%s2298_s7 + $0x20] sm:$0xff]  ;;  %v504_v10 = vld [vmem:[%s2298_s7 + $0x8] sm:$0xff]  ;;  %v505_v11 = vld [vmem:[%s2298_s7 + $0x10] sm:$0xff] }
  0x4a   : > { %562 = vmatpush.msra.mxu0 %v524_v49 }
  0x4b   : > { %588 = vmatpush.msra.mxu1 %v525_v50  ;;  %614 = vmatpush.msra.mxu2 %v526_v51 }
  0x4c   : > { %563 = vmatpush.msra.mxu0 %v521_v52 }
  0x4d   : > { %589 = vmatpush.msra.mxu1 %v522_v53  ;;  %615 = vmatpush.msra.mxu2 %v523_v54 }
  0x4e   : > { %564 = vmatpush.msra.mxu0 %v518_v55 }
  0x4f   : > { %590 = vmatpush.msra.mxu1 %v519_v56  ;;  %616 = vmatpush.msra.mxu2 %v520_v57 }
  0x50   : > { %565 = vmatpush.msra.mxu0 %v515_v58 }
  0x51   : > { %591 = vmatpush.msra.mxu1 %v516_v59  ;;  %617 = vmatpush.msra.mxu2 %v517_v60 }
  0x52   : > { %566 = vmatpush.msra.mxu0 %v512_v61 }
  0x53   : > { %592 = vmatpush.msra.mxu1 %v513_v62  ;;  %618 = vmatpush.msra.mxu2 %v514_v63 }
  0x54   : > { %567 = vmatpush.msra.mxu0 %v509_v0 }
  0x55   : > { %593 = vmatpush.msra.mxu1 %v510_v1  ;;  %619 = vmatpush.msra.mxu2 %v511_v2 }
  0x56   : > { %568 = vmatpush.msra.mxu0 %v506_v6 }
  0x57   : > { %594 = vmatpush.msra.mxu1 %v507_v7  ;;  %620 = vmatpush.msra.mxu2 %v508_v8 }
  0x58   : > { %569 = vmatpush.msra.mxu0 %v503_v9 }
  0x59   : > { %595 = vmatpush.msra.mxu1 %v504_v10  ;;  %621 = vmatpush.msra.mxu2 %v505_v11  ;;  %v2440_v11 = vld [vmem:[%s2316_s13 + $0x10] sm:$0xff] }
  0xb1   : > { %v429_v19 = vpop.xlane.xlu0 %428 }
  0xb2   : > { %v441_v20 = vmul.f32 %v2358_v18, %v429_v19 }
  0xb3   : > { %v433_v24 = vpop.xlane.xlu1 %432 }
  0xb4   : > { %v2362_v21 = vsub.f32 %v2341_v3, %v441_v20  ;;  %v443_v27 = vmul.f32 %v2358_v18, %v433_v24 }
  0xb6   : > { %v447_v22 = vmul.f32 %v2362_v21, %v2362_v21  ;;  %v2374_v29 = vsub.f32 %v2344_v4, %v443_v27 }
  0xb8   : > { %450 = vadd.xlane.f32.xlu1 %v447_v22  ;;  %v449_v30 = vmul.f32 %v2374_v29, %v2374_v29 }
  0xb9   : > { %v431_v23 = vpop.xlane.xlu0 %430 }
  0xba   : > { %v442_v25 = vmul.f32 %v2358_v18, %v431_v23 }
  0xbc   : > { %v2368_v26 = vsub.f32 %v2349_v5, %v442_v25 }
  0xbe   : > { %v448_v28 = vmul.f32 %v2368_v26, %v2368_v26 }
  0xc0   : > { %452 = vadd.xlane.f32.xlu2 %v448_v28  ;;  %v2424_v28 = vld [vmem:[%s2316_s13] sm:$0xff] }
  0xc1   : > { %v495_v34 = vperm.slane %v2424_v28, 0  ;;  %v499_v38 = vperm.slane %v2424_v28, 1  ;;  %v551_v61 = vperm.slane %v2424_v28, 2 }
  0xc8   : > { %454 = vadd.xlane.f32.xlu2 %v449_v30 }
 0x12b   : > { %v451_v12 = vpop.xlane.xlu1 %450 }
 0x12c   : > { %v456_v13 = vmul.f32 %v451_v12, %v2358_v18 }
 0x12e   : > { %v459_v14 = vadd.f32 1e-05, %v456_v13 }
 0x130   : > { %1953 = vrsqrt.f32 %v459_v14  ;;  %vm468_vm2 = vweird.f32 %v459_v14 }
 0x133   : > { %v453_v15 = vpop.xlane.xlu2 %452 }
 0x134   : > { %v457_v16 = vmul.f32 %v453_v15, %v2358_v18 }
 0x136   : > { %v1954_v17 = vpop.eup %1953  ;;  %v460_v19 = vadd.f32 1e-05, %v457_v16 }
 0x137   : > { %v463_v20 = vmul.f32 %v1954_v17, %v459_v14  ;;  %vm469_vm1 = vweird.f32 %v1954_v17  ;;  %v553_v14 = vperm.slane %v2440_v11, 2 }
 0x138   : > { %1955 = vrsqrt.f32 %v460_v19  ;;  %vm470_vm3 = vmor %vm468_vm2, %vm469_vm1  ;;  %vm478_vm5 = vweird.f32 %v460_v19 }
 0x139   : > { %v464_v22 = vmul.f32 %v1954_v17, %v463_v20 }
 0x13b   : > { %v465_v23 = vmul.f32 0.5, %v464_v22  ;;  %v455_v24 = vpop.xlane.xlu2 %454 }
 0x13c   : > { %v458_v25 = vmul.f32 %v455_v24, %v2358_v18 }
 0x13d   : > { %v466_v27 = vsub.f32 1.5, %v465_v23 }
 0x13e   : > { %v1956_v30 = vpop.eup %1955  ;;  %v461_v31 = vadd.f32 1e-05, %v458_v25 }
 0x13f   : > { %v467_v32 = vmul.f32 %v1954_v17, %v466_v27  ;;  %v473_v33 = vmul.f32 %v1956_v30, %v460_v19  ;;  %vm479_vm4 = vweird.f32 %v1956_v30 }
 0x140   : > { %1957 = vrsqrt.f32 %v461_v31  ;;  %vm480_vm6 = vmor %vm478_vm5, %vm479_vm4  ;;  %vm488_vm8 = vweird.f32 %v461_v31 }
 0x141   : > { %v471_v35 = vsel %vm470_vm3, %v1954_v17, %v467_v32  ;;  %v474_v36 = vmul.f32 %v1956_v30, %v473_v33 }
 0x142   : > { %v492_v37 = vmul.f32 %v471_v35, %v2362_v21 }
 0x143   : > { %v475_v39 = vmul.f32 0.5, %v474_v36 }
 0x144   : > { %v496_v40 = vmul.f32 %v495_v34, %v492_v37 }
 0x145   : > { %v476_v41 = vsub.f32 1.5, %v475_v39 }
 0x146   : > { %v1958_v42 = vpop.eup %1957  ;;  %v500_v43 = vadd.f32 %v499_v38, %v496_v40 }
 0x147   : > { %v477_v44 = vmul.f32 %v1956_v30, %v476_v41  ;;  %v483_v45 = vmul.f32 %v1958_v42, %v461_v31  ;;  %vm489_vm7 = vweird.f32 %v1958_v42 }
 0x148   : > { %570 = vmatmul.f32.vlgmr.msra.gmra.mxu0 %v500_v43  ;;  %596 = vmatmul.f32.vlgmr.msra.gmra.mxu1 %v500_v43  ;;  %vm490_vm9 = vmor %vm488_vm8, %vm489_vm7 }
 0x149   : > { %v481_v46 = vsel %vm480_vm6, %v1956_v30, %v477_v44  ;;  %v484_v47 = vmul.f32 %v1958_v42, %v483_v45  ;;  %622 = vmatmul.f32.vlgmr.msra.gmra.mxu2 %v500_v43  ;;  %v651_v30 = vlaneseq }
 0x14a   : > { %v493_v48 = vmul.f32 %v481_v46, %v2368_v26  ;;  %v2432_v26 = vld [vmem:[%s2316_s13 + $0x8] sm:$0xff] }
 0x14b   : > { %v485_v21 = vmul.f32 0.5, %v484_v47  ;;  %v552_v57 = vperm.slane %v2432_v26, 2  ;;  %v652_v32 = vand.u32 127, %v651_v30 }
 0x14c   : > { %v497_v49 = vmul.f32 %v495_v34, %v493_v48 }
 0x14d   : > { %v486_v50 = vsub.f32 1.5, %v485_v21  ;;  %vm653_vm11 = vcmp.lt.s32.totalorder %v652_v32, 17 }
 0x14e   : > { %v501_v51 = vadd.f32 %v499_v38, %v497_v49 }
 0x14f   : > { %v487_v52 = vmul.f32 %v1958_v42, %v486_v50 }
 0x150   : > { %573 = vmatmul.f32.gmra.mxu0 %v501_v51  ;;  %599 = vmatmul.f32.gmra.mxu1 %v501_v51 }
 0x151   : > { %v491_v53 = vsel %vm490_vm9, %v1958_v42, %v487_v52  ;;  %625 = vmatmul.f32.gmra.mxu2 %v501_v51 }
 0x152   : > { %v494_v54 = vmul.f32 %v491_v53, %v2374_v29 }
 0x154   : > { %v498_v55 = vmul.f32 %v495_v34, %v494_v54 }
 0x156   : > { %v502_v56 = vadd.f32 %v499_v38, %v498_v55 }
 0x158   : > { %576 = vmatmul.f32.gmra.mxu0 %v502_v56  ;;  %602 = vmatmul.f32.gmra.mxu1 %v502_v56 }
 0x159   : > { %628 = vmatmul.f32.gmra.mxu2 %v502_v56 }
 0x1c5   : > { %v571_v58 = vpop.f32.mrf.mxu0  ;;  %v597_v59 = vpop.f32.mrf.mxu1 }
 0x1c6   : > { %v598_v60 = vadd.f32 %v597_v59, %v552_v57  ;;  %v572_v13 = vadd.f32 %v571_v58, %v551_v61 }
 0x1c8   : > { %779 = vrot.lane.b32.xlu2 %v598_v60, %s2175_s24  ;;  %v632_v19 = vmul.f32 0.125, %v572_v13 }
 0x1cc   : > { %v623_v62 = vpop.f32.mrf.mxu2 }
 0x1cd   : > { %v574_v29 = vpop.f32.mrf.mxu0  ;;  %v600_v63 = vpop.f32.mrf.mxu1  ;;  %v624_v22 = vadd.f32 %v623_v62, %v553_v14 }
 0x1ce   : > { %v575_v0 = vadd.f32 %v574_v29, %v551_v61  ;;  %v601_v1 = vadd.f32 %v600_v63, %v552_v57 }
 0x1d0   : > { %v633_v2 = vmul.f32 0.125, %v575_v0  ;;  %781 = vrot.lane.b32.xlu1 %v601_v1, %s2175_s24 }
 0x1d2   : > { %775 = vrot.lane.b32.xlu2 %v633_v2, %s2175_s24 }
 0x1d4   : > { %v626_v6 = vpop.f32.mrf.mxu2 }
 0x1d5   : > { %v577_v7 = vpop.f32.mrf.mxu0  ;;  %v603_v8 = vpop.f32.mrf.mxu1  ;;  %v2447_v16 = vadd.f32 %v626_v6, %v553_v14 }
 0x1d6   : > { %v578_v9 = vadd.f32 %v577_v7, %v551_v61  ;;  %v604_v10 = vadd.f32 %v603_v8, %v552_v57 }
 0x1d8   : > { %v634_v12 = vmul.f32 0.125, %v578_v9  ;;  %783 = vrot.lane.b32.xlu0 %v604_v10, %s2175_s24  ;;  %1819 = vmatpush.xpose.msk.msra.mxu3 %vm654_vm10, %v604_v10 }
 0x1da   : > { %777 = vrot.lane.b32.xlu1 %v634_v12, %s2175_s24 }
 0x1dc   : > { %v629_v15 = vpop.f32.mrf.mxu2  ;;  %1820 = vmatpush.xpose.msk.msra.mxu3 %vm654_vm10, %v601_v1 }
 0x1dd   : > { %v2449_v17 = vadd.f32 %v629_v15, %v553_v14 }
 0x1df   : > { %v1946_v20 = vpack.i.bf16 %v2447_v16, %v2449_v17 }
 0x1e0   : > { %773 = vrot.lane.b32.xlu0 %v632_v19, %s2175_s24  ;;  %1821 = vmatpush.xpose.msk.msra.mxu3 %vm654_vm10, %v598_v60 }
 0x1e3   : > { %1822 = vmatmul.msk.f32.vlgmr.msra.gmra.mxu3 %vm654_vm10, %v632_v19 }
 0x1e4   : > { %760 = vmatpush.msrb.mxu3 %v2449_v17 }
 0x1e6   : > { %761 = vmatpush.msrb.mxu3 %v2447_v16 }
 0x1e8   : > { %762 = vmatpush.msrb.mxu3 %v624_v22 }
 0x1eb   : > { %1823 = vmatmul.msk.f32.gmra.mxu3 %vm654_vm10, %v633_v2 }
 0x1f3   : > { %1824 = vmatmul.msk.f32.gmra.mxu3 %vm654_vm10, %v634_v12 }
 0x222   : > { %v780_v25 = vpop.permute.xlu2 %779 }
 0x22c   : > { %v776_v31 = vpop.permute.xlu2 %775 }
 0x242   : > { %v782_v24 = vpop.permute.xlu1 %781 }
 0x24a   : > { %v784_v23 = vpop.permute.xlu0 %783 }
 0x24b   : > { %1828 = vmatpush.xpose.msk.msrb.mxu0 %vm654_vm10, %v784_v23 }
 0x24c   : > { %v778_v33 = vpop.permute.xlu1 %777 }
 0x24f   : > { %1829 = vmatpush.xpose.msk.msrb.mxu0 %vm654_vm10, %v782_v24 }
 0x252   : > { %v774_v27 = vpop.permute.xlu0 %773 }
 0x253   : > { %1830 = vmatpush.xpose.msk.msrb.mxu0 %vm654_vm10, %v780_v25 }
 0x256   : > { %1831 = vmatmul.msk.f32.vlgmr.msrb.gmra.mxu0 %vm654_vm10, %v774_v27 }
 0x25e   : > { %1832 = vmatmul.msk.f32.gmra.mxu0 %vm654_vm10, %v776_v31 }
 0x266   : > { %v690_v34 = vpop.f32.mrf.mxu3  ;;  %1833 = vmatmul.msk.f32.gmra.mxu0 %vm654_vm10, %v778_v33 }
 0x267   : > { %v701_v35 = vsel %vm653_vm11, %v690_v34, -1e+30 }
 0x268   : > { %v705_v36 = vsel %vm704_vm12, %v701_v35, -inf }
 0x269   : > { %706 = vmax.xlane.f32.xlu0 %v705_v36  ;;  %v641_v36 = vld [vmem:[%s2304_s11 + $0x30] sm:$0xff] }
 0x26e   : > { %v693_v37 = vpop.f32.mrf.mxu3 }
 0x26f   : > { %v702_v38 = vsel %vm653_vm11, %v693_v37, -1e+30  ;;  %v640_v37 = vld [vmem:[%s2304_s11 + $0x28] sm:$0xff] }
 0x270   : > { %v708_v39 = vsel %vm704_vm12, %v702_v38, -inf }
 0x271   : > { %709 = vmax.xlane.f32.xlu1 %v708_v39  ;;  %v638_v39 = vld [vmem:[%s2304_s11 + $0x18] sm:$0xff] }
 0x276   : > { %v696_v43 = vpop.f32.mrf.mxu3 }
 0x277   : > { %v703_v44 = vsel %vm653_vm11, %v696_v43, -1e+30 }
 0x278   : > { %v711_v21 = vsel %vm704_vm12, %v703_v44, -inf }
 0x2d3   : > { %v814_v40 = vpop.f32.mrf.mxu0 }
 0x2d4   : > { %v823_v41 = vsel %vm653_vm11, %v814_v40, -1e+30  ;;  %v637_v40 = vld [vmem:[%s2304_s11 + $0x10] sm:$0xff] }
 0x2d5   : > { %v826_v42 = vsel %vm704_vm12, %v823_v41, -inf }
 0x2d6   : > { %827 = vmax.xlane.f32.xlu2 %v826_v42  ;;  %v635_v42 = vld [vmem:[%s2304_s11] sm:$0xff] }
 0x2db   : > { %v817_v45 = vpop.f32.mrf.mxu0 }
 0x2dc   : > { %v824_v46 = vsel %vm653_vm11, %v817_v45, -1e+30  ;;  %v707_v47 = vpop.xlane.xlu0 %706  ;;  %v649_v45 = vld [vmem:[%s2304_s11 + $0x70] sm:$0xff] }
 0x2dd   : > { %v714_v48 = vsub.f32 %v701_v35, %v707_v47  ;;  %v829_v49 = vsel %vm704_vm12, %v824_v46, -inf  ;;  %v642_v35 = vld [vmem:[%s2304_s11 + $0x38] sm:$0xff]  ;;  %v647_v47 = vld [vmem:[%s2304_s11 + $0x60] sm:$0xff] }
 0x2de   : > { %712 = vmax.xlane.f32.xlu2 %v711_v21  ;;  %830 = vmax.xlane.f32.xlu0 %v829_v49 }
 0x2df   : > { %v717_v50 = vmul.f32 1.442695, %v714_v48  ;;  %958 = vmatpush.msra.mxu3 %v642_v35 }
 0x2e1   : > { %1959 = vpow2.f32 %v717_v50  ;;  %959 = vmatpush.msra.mxu3 %v641_v36  ;;  %v646_v50 = vld [vmem:[%s2304_s11 + $0x58] sm:$0xff] }
 0x2e3   : > { %v820_v51 = vpop.f32.mrf.mxu0  ;;  %960 = vmatpush.msra.mxu3 %v640_v37 }
 0x2e4   : > { %v825_v52 = vsel %vm653_vm11, %v820_v51, -1e+30  ;;  %v710_v53 = vpop.xlane.xlu1 %709  ;;  %v645_v51 = vld [vmem:[%s2304_s11 + $0x50] sm:$0xff] }
 0x2e5   : > { %v715_v54 = vsub.f32 %v702_v38, %v710_v53  ;;  %v832_v55 = vsel %vm704_vm12, %v825_v52, -inf  ;;  %v639_v38 = vld [vmem:[%s2304_s11 + $0x20] sm:$0xff] }
 0x2e6   : > { %833 = vmax.xlane.f32.xlu1 %v832_v55  ;;  %961 = vmatpush.msra.mxu3 %v639_v38 }
 0x2e7   : > { %v1960_v56 = vpop.eup %1959  ;;  %v719_v57 = vmul.f32 1.442695, %v715_v54 }
 0x2e8   : > { %v723_v58 = vsel %vm704_vm12, %v1960_v56, 0.0  ;;  %962 = vmatpush.msra.mxu3 %v638_v39 }
 0x2e9   : > { %1961 = vpow2.f32 %v719_v57  ;;  %724 = vadd.xlane.f32.xlu0 %v723_v58 }
 0x2ea   : > { %963 = vmatpush.msra.mxu3 %v637_v40 }
 0x2ef   : > { %v1962_v59 = vpop.eup %1961 }
 0x2f0   : > { %v726_v60 = vsel %vm704_vm12, %v1962_v59, 0.0 }
 0x2f1   : > { %727 = vadd.xlane.f32.xlu1 %v726_v60 }
 0x2fd   : > { %1947 = vrot.lane.b32.xlu0 %v1946_v20, %s2175_s24 }
 0x30a   : > { %862 = vrot.lane.b32.xlu1 %v624_v22, %s2175_s24 }
 0x349   : > { %v828_v61 = vpop.xlane.xlu2 %827 }
 0x34a   : > { %v835_v63 = vsub.f32 %v823_v41, %v828_v61  ;;  %v636_v41 = vld [vmem:[%s2304_s11 + $0x8] sm:$0xff] }
 0x34b   : > { %964 = vmatpush.msra.mxu3 %v636_v41 }
 0x34c   : > { %v838_v2 = vmul.f32 1.442695, %v835_v63 }
 0x34d   : > { %965 = vmatpush.msra.mxu3 %v635_v42 }
 0x351   : > { %v713_v62 = vpop.xlane.xlu2 %712  ;;  %v831_v0 = vpop.xlane.xlu0 %830 }
 0x352   : > { %v716_v29 = vsub.f32 %v703_v44, %v713_v62  ;;  %v836_v6 = vsub.f32 %v824_v46, %v831_v0  ;;  %v650_v44 = vld [vmem:[%s2304_s11 + $0x78] sm:$0xff]  ;;  %v648_v46 = vld [vmem:[%s2304_s11 + $0x68] sm:$0xff] }
 0x353   : > { %923 = vmatpush.msrb.mxu2 %v650_v44  ;;  %v644_v62 = vld [vmem:[%s2304_s11 + $0x48] sm:$0xff] }
 0x354   : > { %v721_v1 = vmul.f32 1.442695, %v716_v29  ;;  %v840_v12 = vmul.f32 1.442695, %v836_v6  ;;  %v643_v29 = vld [vmem:[%s2304_s11 + $0x40] sm:$0xff] }
 0x355   : > { %924 = vmatpush.msrb.mxu2 %v649_v45  ;;  %v1103_v45 = vld [vmem:[%s2324_s25 + $0x1a0] sm:$0xff] }
 0x356   : > { %1963 = vpow2.f32 %v721_v1 }
 0x357   : > { %1965 = vpow2.f32 %v838_v2  ;;  %925 = vmatpush.msrb.mxu2 %v648_v46  ;;  %v1104_v46 = vld [vmem:[%s2324_s25 + $0x1a8] sm:$0xff] }
 0x359   : > { %v834_v7 = vpop.xlane.xlu1 %833  ;;  %926 = vmatpush.msrb.mxu2 %v647_v47  ;;  %v1105_v47 = vld [vmem:[%s2324_s25 + $0x1b0] sm:$0xff] }
 0x35a   : > { %v837_v17 = vsub.f32 %v825_v52, %v834_v7  ;;  %v976_v7 = vperm.slane %v2424_v28, 3 }
 0x35b   : > { %927 = vmatpush.msrb.mxu2 %v646_v50  ;;  %v1101_v50 = vld [vmem:[%s2324_s25 + $0x190] sm:$0xff] }
 0x35c   : > { %v725_v8 = vpop.xlane.xlu0 %724  ;;  %v1964_v9 = vpop.eup %1963  ;;  %v842_v20 = vmul.f32 1.442695, %v837_v17 }
 0x35d   : > { %1967 = vrcp.f32 %v725_v8  ;;  %v729_v10 = vsel %vm704_vm12, %v1964_v9, 0.0  ;;  %v2486_v13 = vpop.eup %1965  ;;  %928 = vmatpush.msrb.mxu2 %v645_v51  ;;  %v1102_v51 = vld [vmem:[%s2324_s25 + $0x198] sm:$0xff] }
 0x35e   : > { %730 = vadd.xlane.f32.xlu2 %v729_v10  ;;  %1969 = vpow2.f32 %v840_v12  ;;  %v844_v19 = vsel %vm704_vm12, %v2486_v13, 0.0 }
 0x35f   : > { %929 = vmatpush.msrb.mxu2 %v644_v62  ;;  %v1089_v62 = vld [vmem:[%s2324_s25 + $0x130] sm:$0xff] }
 0x361   : > { %930 = vmatpush.msrb.mxu2 %v643_v29  ;;  %v1090_v29 = vld [vmem:[%s2324_s25 + $0x138] sm:$0xff] }
 0x363   : > { %v1968_v14 = vpop.eup %1967 }
 0x364   : > { %v728_v15 = vpop.xlane.xlu1 %727  ;;  %v735_v16 = vmul.f32 %v1968_v14, %v1960_v56  ;;  %v1970_v22 = vpop.eup %1969 }
 0x365   : > { %1971 = vrcp.f32 %v728_v15  ;;  %v847_v25 = vsel %vm704_vm12, %v1970_v22, 0.0 }
 0x366   : > { %1825 = vmatmul.msk.f32.vlgmr.msrb.gmra.mxu3 %vm704_vm12, %v735_v16  ;;  %845 = vadd.xlane.f32.xlu2 %v844_v19  ;;  %1973 = vpow2.f32 %v842_v20 }
 0x36b   : > { %v1972_v23 = vpop.eup %1971 }
 0x36c   : > { %v736_v24 = vmul.f32 %v1972_v23, %v1962_v59  ;;  %v1974_v32 = vpop.eup %1973 }
 0x36d   : > { %v850_v33 = vsel %vm704_vm12, %v1974_v32, 0.0 }
 0x36e   : > { %1826 = vmatmul.msk.f32.gmra.mxu3 %vm704_vm12, %v736_v24  ;;  %848 = vadd.xlane.f32.xlu2 %v847_v25  ;;  %v1111_v24 = vld [vmem:[%s2324_s25 + $0x1e0] sm:$0xff]  ;;  %v1112_v25 = vld [vmem:[%s2324_s25 + $0x1e8] sm:$0xff] }
 0x36f   : > { %v1948_v27 = vpop.permute.xlu0 %1947  ;;  %1119 = vmatpush.msra.mxu0 %v1111_v24  ;;  %v1068_v24 = vld [vmem:[%s2324_s25 + $0x88] sm:$0xff] }
 0x370   : > { %v1949_v30 = vunpack.i.l.bf16 %v1948_v27  ;;  %v1950_v31 = vunpack.i.h.bf16 %v1948_v27  ;;  %v1113_v27 = vld [vmem:[%s2324_s25 + $0x1f0] sm:$0xff] }
 0x371   : > { %1171 = vmatpush.msra.mxu2 %v1113_v27  ;;  %v1070_v27 = vld [vmem:[%s2324_s25 + $0x98] sm:$0xff] }
 0x372   : > { %893 = vmatpush.msrb.mxu1 %v1949_v30  ;;  %v1107_v30 = vld [vmem:[%s2324_s25 + $0x1c0] sm:$0xff] }
 0x373   : > { %1120 = vmatpush.msra.mxu0 %v1107_v30  ;;  %v1064_v30 = vld [vmem:[%s2324_s25 + $0x68] sm:$0xff] }
 0x374   : > { %894 = vmatpush.msrb.mxu1 %v1950_v31  ;;  %v1108_v31 = vld [vmem:[%s2324_s25 + $0x1c8] sm:$0xff] }
 0x375   : > { %1121 = vmatpush.msra.mxu0 %v1103_v45  ;;  %v1053_v45 = vld [vmem:[%s2324_s25 + $0x10] sm:$0xff] }
 0x376   : > { %851 = vadd.xlane.f32.xlu2 %v850_v33  ;;  %v1110_v33 = vld [vmem:[%s2324_s25 + $0x1d8] sm:$0xff] }
 0x37c   : > { %v863_v34 = vpop.permute.xlu1 %862 }
 0x37d   : > { %895 = vmatpush.msrb.mxu1 %v863_v34 }
 0x37f   : > { %1145 = vmatpush.msra.mxu1 %v1112_v25  ;;  %v1069_v25 = vld [vmem:[%s2324_s25 + $0x90] sm:$0xff] }
 0x381   : > { %1146 = vmatpush.msra.mxu1 %v1108_v31  ;;  %v1065_v31 = vld [vmem:[%s2324_s25 + $0x70] sm:$0xff] }
 0x383   : > { %1147 = vmatpush.msra.mxu1 %v1104_v46  ;;  %v1054_v46 = vld [vmem:[%s2324_s25 + $0x18] sm:$0xff] }
 0x3d1   : > { %v731_v43 = vpop.xlane.xlu2 %730 }
 0x3d2   : > { %1975 = vrcp.f32 %v731_v43 }
 0x3d8   : > { %v1976_v48 = vpop.eup %1975 }
 0x3d9   : > { %v846_v21 = vpop.xlane.xlu2 %845  ;;  %v737_v49 = vmul.f32 %v1976_v48, %v1964_v9  ;;  %v1106_v48 = vld [vmem:[%s2324_s25 + $0x1b8] sm:$0xff] }
 0x3da   : > { %1977 = vrcp.f32 %v846_v21  ;;  %v1099_v21 = vld [vmem:[%s2324_s25 + $0x180] sm:$0xff] }
 0x3db   : > { %1827 = vmatmul.msk.f32.gmra.mxu3 %vm704_vm12, %v737_v49  ;;  %v1100_v49 = vld [vmem:[%s2324_s25 + $0x188] sm:$0xff]  ;;  %1122 = vmatpush.msra.mxu0 %v1099_v21 }
 0x3dc   : > { %1148 = vmatpush.msra.mxu1 %v1100_v49 }
 0x3e0   : > { %v1978_v52 = vpop.eup %1977 }
 0x3e1   : > { %v849_v53 = vpop.xlane.xlu2 %848  ;;  %v856_v54 = vmul.f32 %v1978_v52, %v2486_v13  ;;  %v1095_v52 = vld [vmem:[%s2324_s25 + $0x160] sm:$0xff] }
 0x3e2   : > { %1979 = vrcp.f32 %v849_v53  ;;  %v1096_v53 = vld [vmem:[%s2324_s25 + $0x168] sm:$0xff]  ;;  %1123 = vmatpush.msra.mxu0 %v1095_v52 }
 0x3e3   : > { %1834 = vmatmul.msk.f32.vlgmr.msrb.gmra.mxu1 %vm704_vm12, %v856_v54  ;;  %v1097_v54 = vld [vmem:[%s2324_s25 + $0x170] sm:$0xff] }
 0x3e4   : > { %1149 = vmatpush.msra.mxu1 %v1096_v53 }
 0x3e8   : > { %v1980_v55 = vpop.eup %1979 }
 0x3e9   : > { %v764_v56 = vpop.f32.mrf.mxu3  ;;  %v852_v57 = vpop.xlane.xlu2 %851  ;;  %v857_v58 = vmul.f32 %v1980_v55, %v1970_v22  ;;  %v1098_v55 = vld [vmem:[%s2324_s25 + $0x178] sm:$0xff] }
 0x3ea   : > { %1840 = vmatmul.msk.f32.vlgmr.msra.gmra.mxu3 %vm654_vm10, %v764_v56  ;;  %1981 = vrcp.f32 %v852_v57  ;;  %v1091_v56 = vld [vmem:[%s2324_s25 + $0x140] sm:$0xff]  ;;  %v1092_v57 = vld [vmem:[%s2324_s25 + $0x148] sm:$0xff] }
 0x3eb   : > { %1835 = vmatmul.msk.f32.gmra.mxu1 %vm704_vm12, %v857_v58  ;;  %v1093_v58 = vld [vmem:[%s2324_s25 + $0x150] sm:$0xff]  ;;  %1124 = vmatpush.msra.mxu0 %v1091_v56 }
 0x3ec   : > { %1150 = vmatpush.msra.mxu1 %v1092_v57 }
 0x3f0   : > { %v1982_v59 = vpop.eup %1981 }
 0x3f1   : > { %v767_v60 = vpop.f32.mrf.mxu3  ;;  %v858_v61 = vmul.f32 %v1982_v59, %v1974_v32  ;;  %v1109_v32 = vld [vmem:[%s2324_s25 + $0x1d0] sm:$0xff]  ;;  %v1094_v59 = vld [vmem:[%s2324_s25 + $0x158] sm:$0xff] }
 0x3f2   : > { %1841 = vmatmul.msk.f32.gmra.mxu3 %vm654_vm10, %v767_v60  ;;  %1172 = vmatpush.msra.mxu2 %v1109_v32  ;;  %v1087_v60 = vld [vmem:[%s2324_s25 + $0x120] sm:$0xff]  ;;  %v1066_v32 = vld [vmem:[%s2324_s25 + $0x78] sm:$0xff] }
 0x3f3   : > { %1836 = vmatmul.msk.f32.gmra.mxu1 %vm704_vm12, %v858_v61  ;;  %v1088_v61 = vld [vmem:[%s2324_s25 + $0x128] sm:$0xff]  ;;  %1125 = vmatpush.msra.mxu0 %v1087_v60 }
 0x3f4   : > { %1173 = vmatpush.msra.mxu2 %v1105_v47  ;;  %1151 = vmatpush.msra.mxu1 %v1088_v61 }
 0x3f6   : > { %1174 = vmatpush.msra.mxu2 %v1101_v50 }
 0x3f8   : > { %1175 = vmatpush.msra.mxu2 %v1097_v54 }
 0x3fa   : > { %1176 = vmatpush.msra.mxu2 %v1093_v58 }
 0x3fc   : > { %1177 = vmatpush.msra.mxu2 %v1089_v62 }
 0x45e   : > { %v770_v63 = vpop.f32.mrf.mxu3 }
 0x45f   : > { %1842 = vmatmul.msk.f32.gmra.mxu3 %vm654_vm10, %v770_v63  ;;  %v1083_v63 = vld [vmem:[%s2324_s25 + $0x100] sm:$0xff] }
 0x460   : > { %v897_v0 = vpop.f32.mrf.mxu1  ;;  %1126 = vmatpush.msra.mxu0 %v1083_v63 }
 0x461   : > { %1837 = vmatmul.msk.f32.vlgmr.msrb.gmra.mxu2 %vm654_vm10, %v897_v0  ;;  %v1084_v0 = vld [vmem:[%s2324_s25 + $0x108] sm:$0xff] }
 0x462   : > { %1152 = vmatpush.msra.mxu1 %v1084_v0 }
 0x468   : > { %v900_v1 = vpop.f32.mrf.mxu1 }
 0x469   : > { %1838 = vmatmul.msk.f32.gmra.mxu2 %vm654_vm10, %v900_v1  ;;  %v1085_v1 = vld [vmem:[%s2324_s25 + $0x110] sm:$0xff] }
 0x46a   : > { %1178 = vmatpush.msra.mxu2 %v1085_v1 }
 0x46d   : > { %v967_v6 = vpop.f32.mrf.mxu3 }
 0x470   : > { %v903_v2 = vpop.f32.mrf.mxu1 }
 0x471   : > { %1839 = vmatmul.msk.f32.gmra.mxu2 %vm654_vm10, %v903_v2  ;;  %v1086_v2 = vld [vmem:[%s2324_s25 + $0x118] sm:$0xff] }
 0x475   : > { %v970_v13 = vpop.f32.mrf.mxu3 }
 0x4e2   : > { %v973_v19 = vpop.f32.mrf.mxu3 }
 0x4e4   : > { %v932_v8 = vpop.f32.mrf.mxu2 }
 0x4e5   : > { %v968_v9 = vadd.f32 %v967_v6, %v932_v8  ;;  %v1079_v6 = vld [vmem:[%s2324_s25 + $0xe0] sm:$0xff]  ;;  %v1081_v8 = vld [vmem:[%s2324_s25 + $0xf0] sm:$0xff] }
 0x4e6   : > { %1127 = vmatpush.msra.mxu0 %v1079_v6  ;;  %1179 = vmatpush.msra.mxu2 %v1081_v8 }
 0x4e7   : > { %v977_v10 = vadd.f32 %v976_v7, %v968_v9  ;;  %v1082_v9 = vld [vmem:[%s2324_s25 + $0xf8] sm:$0xff] }
 0x4e9   : > { %v2523_v12 = vadd.f32 %v977_v10, %v2341_v3  ;;  %v1075_v10 = vld [vmem:[%s2324_s25 + $0xc0] sm:$0xff] }
 0x4ea   : > { %1128 = vmatpush.msra.mxu0 %v1075_v10 }
 0x4eb   : > { %983 = vadd.xlane.f32.xlu0 %v2523_v12 }
 0x4ec   : > { %v935_v14 = vpop.f32.mrf.mxu2 }
 0x4ed   : > { %v971_v15 = vadd.f32 %v970_v13, %v935_v14  ;;  %v1076_v13 = vld [vmem:[%s2324_s25 + $0xc8] sm:$0xff]  ;;  %v1077_v14 = vld [vmem:[%s2324_s25 + $0xd0] sm:$0xff] }
 0x4ee   : > { %1180 = vmatpush.msra.mxu2 %v1077_v14 }
 0x4ef   : > { %v978_v16 = vadd.f32 %v976_v7, %v971_v15  ;;  %v1078_v15 = vld [vmem:[%s2324_s25 + $0xd8] sm:$0xff] }
 0x4f1   : > { %v2527_v17 = vadd.f32 %v978_v16, %v2349_v5  ;;  %v1114_v5 = vld [vmem:[%s2324_s25 + $0x1f8] sm:$0xff]  ;;  %v1071_v16 = vld [vmem:[%s2324_s25 + $0xa0] sm:$0xff] }
 0x4f2   : > { %1197 = vmatpush.msrb.mxu3 %v1114_v5  ;;  %1129 = vmatpush.msra.mxu0 %v1071_v16  ;;  %v1063_v5 = vld [vmem:[%s2324_s25 + $0x60] sm:$0xff] }
 0x4f3   : > { %985 = vadd.xlane.f32.xlu2 %v2527_v17 }
 0x4f4   : > { %v938_v20 = vpop.f32.mrf.mxu2  ;;  %1198 = vmatpush.msrb.mxu3 %v1110_v33  ;;  %v1059_v33 = vld [vmem:[%s2324_s25 + $0x40] sm:$0xff] }
 0x4f5   : > { %v974_v3 = vadd.f32 %v973_v19, %v938_v20  ;;  %v1072_v19 = vld [vmem:[%s2324_s25 + $0xa8] sm:$0xff]  ;;  %v1073_v20 = vld [vmem:[%s2324_s25 + $0xb0] sm:$0xff] }
 0x4f6   : > { %1199 = vmatpush.msrb.mxu3 %v1106_v48  ;;  %1181 = vmatpush.msra.mxu2 %v1073_v20 }
 0x4f7   : > { %v979_v22 = vadd.f32 %v976_v7, %v974_v3  ;;  %v1080_v7 = vld [vmem:[%s2324_s25 + $0xe8] sm:$0xff]  ;;  %v1074_v3 = vld [vmem:[%s2324_s25 + $0xb8] sm:$0xff] }
 0x4f8   : > { %1200 = vmatpush.msrb.mxu3 %v1102_v51  ;;  %1153 = vmatpush.msra.mxu1 %v1080_v7 }
 0x4f9   : > { %v2531_v23 = vadd.f32 %v979_v22, %v2344_v4  ;;  %v1067_v22 = vld [vmem:[%s2324_s25 + $0x80] sm:$0xff]  ;;  %1182 = vmatpush.msra.mxu2 %v1069_v25 }
 0x4fa   : > { %1201 = vmatpush.msrb.mxu3 %v1098_v55  ;;  %1154 = vmatpush.msra.mxu1 %v1076_v13 }
 0x4fb   : > { %987 = vadd.xlane.f32.xlu1 %v2531_v23  ;;  %1130 = vmatpush.msra.mxu0 %v1067_v22 }
 0x4fc   : > { %1202 = vmatpush.msrb.mxu3 %v1094_v59  ;;  %1155 = vmatpush.msra.mxu1 %v1072_v19 }
 0x4fd   : > { %1131 = vmatpush.msra.mxu0 %v1063_v5  ;;  %1183 = vmatpush.msra.mxu2 %v1065_v31  ;;  %v1506_v5 = vld [vmem:[%s2329_s27 + $0xf8] sm:$0xff]  ;;  %v1505_v31 = vld [vmem:[%s2329_s27 + $0xf0] sm:$0xff] }
 0x4fe   : > { %1203 = vmatpush.msrb.mxu3 %v1090_v29  ;;  %1156 = vmatpush.msra.mxu1 %v1068_v24  ;;  %v1043_v29 = vperm.slane %v2424_v28, 4 }
 0x4ff   : > { %1132 = vmatpush.msra.mxu0 %v1059_v33  ;;  %v1487_v33 = vld [vmem:[%s2329_s27 + $0x60] sm:$0xff] }
 0x500   : > { %1204 = vmatpush.msrb.mxu3 %v1086_v2  ;;  %1157 = vmatpush.msra.mxu1 %v1064_v30  ;;  %v1047_v2 = vperm.slane %v2424_v28, 5  ;;  %v1489_v30 = vld [vmem:[%s2329_s27 + $0x70] sm:$0xff] }
 0x502   : > { %1205 = vmatpush.msrb.mxu3 %v1082_v9 }
 0x504   : > { %1206 = vmatpush.msrb.mxu3 %v1078_v15 }
 0x506   : > { %1207 = vmatpush.msrb.mxu3 %v1074_v3 }
 0x508   : > { %1208 = vmatpush.msrb.mxu3 %v1070_v27  ;;  %v1490_v27 = vld [vmem:[%s2329_s27 + $0x78] sm:$0xff] }
 0x50a   : > { %1209 = vmatpush.msrb.mxu3 %v1066_v32  ;;  %v1504_v32 = vld [vmem:[%s2329_s27 + $0xe8] sm:$0xff] }
 0x55e   : > { %v984_v4 = vpop.xlane.xlu0 %983 }
 0x55f   : > { %v989_v34 = vmul.f32 %v984_v4, %v2358_v18  ;;  %v1060_v4 = vld [vmem:[%s2324_s25 + $0x48] sm:$0xff] }
 0x560   : > { %1158 = vmatpush.msra.mxu1 %v1060_v4  ;;  %v1503_v4 = vld [vmem:[%s2329_s27 + $0xe0] sm:$0xff] }
 0x561   : > { %v2544_v35 = vsub.f32 %v2523_v12, %v989_v34  ;;  %v1061_v34 = vld [vmem:[%s2324_s25 + $0x50] sm:$0xff] }
 0x562   : > { %1184 = vmatpush.msra.mxu2 %v1061_v34  ;;  %v1522_v34 = vld [vmem:[%s2329_s27 + $0x178] sm:$0xff] }
 0x563   : > { %v995_v36 = vmul.f32 %v2544_v35, %v2544_v35 }
 0x565   : > { %998 = vadd.xlane.f32.xlu2 %v995_v36  ;;  %v1062_v36 = vld [vmem:[%s2324_s25 + $0x58] sm:$0xff] }
 0x566   : > { %v986_v37 = vpop.xlane.xlu2 %985  ;;  %1210 = vmatpush.msrb.mxu3 %v1062_v36  ;;  %v1538_v36 = vld [vmem:[%s2329_s27 + $0x1f8] sm:$0xff] }
 0x567   : > { %v990_v38 = vmul.f32 %v986_v37, %v2358_v18  ;;  %v1055_v37 = vld [vmem:[%s2324_s25 + $0x20] sm:$0xff] }
 0x568   : > { %1133 = vmatpush.msra.mxu0 %v1055_v37  ;;  %v1486_v37 = vld [vmem:[%s2329_s27 + $0x58] sm:$0xff] }
 0x569   : > { %v2550_v39 = vsub.f32 %v2527_v17, %v990_v38  ;;  %v1056_v38 = vld [vmem:[%s2324_s25 + $0x28] sm:$0xff] }
 0x56a   : > { %1159 = vmatpush.msra.mxu1 %v1056_v38  ;;  %v1502_v38 = vld [vmem:[%s2329_s27 + $0xd8] sm:$0xff] }
 0x56b   : > { %v996_v40 = vmul.f32 %v2550_v39, %v2550_v39 }
 0x56d   : > { %1000 = vadd.xlane.f32.xlu2 %v996_v40  ;;  %v1057_v40 = vld [vmem:[%s2324_s25 + $0x30] sm:$0xff] }
 0x56e   : > { %v988_v41 = vpop.xlane.xlu1 %987  ;;  %1185 = vmatpush.msra.mxu2 %v1057_v40  ;;  %v1521_v40 = vld [vmem:[%s2329_s27 + $0x170] sm:$0xff] }
 0x56f   : > { %v991_v42 = vmul.f32 %v988_v41, %v2358_v18  ;;  %v1058_v41 = vld [vmem:[%s2324_s25 + $0x38] sm:$0xff] }
 0x570   : > { %1211 = vmatpush.msrb.mxu3 %v1058_v41  ;;  %1186 = vmatpush.msra.mxu2 %v1053_v45  ;;  %v1537_v41 = vld [vmem:[%s2329_s27 + $0x1f0] sm:$0xff]  ;;  %v1520_v45 = vld [vmem:[%s2329_s27 + $0x168] sm:$0xff] }
 0x571   : > { %v2556_v43 = vsub.f32 %v2531_v23, %v991_v42  ;;  %v1051_v42 = vld [vmem:[%s2324_s25] sm:$0xff] }
 0x572   : > { %1134 = vmatpush.msra.mxu0 %v1051_v42  ;;  %1212 = vmatpush.msrb.mxu3 %v1054_v46  ;;  %v1485_v42 = vld [vmem:[%s2329_s27 + $0x50] sm:$0xff]  ;;  %v1536_v46 = vld [vmem:[%s2329_s27 + $0x1e8] sm:$0xff] }
 0x573   : > { %v997_v44 = vmul.f32 %v2556_v43, %v2556_v43  ;;  %1592 = vmatpush.msrb.mxu2 %v1522_v34  ;;  %v1493_v34 = vld [vmem:[%s2329_s27 + $0x90] sm:$0xff] }
 0x574   : > { %1540 = vmatpush.msrb.mxu0 %v1490_v27  ;;  %1618 = vmatpush.msra.mxu3 %v1538_v36  ;;  %v1512_v36 = vld [vmem:[%s2329_s27 + $0x128] sm:$0xff] }
 0x575   : > { %1002 = vadd.xlane.f32.xlu2 %v997_v44  ;;  %v1052_v44 = vld [vmem:[%s2324_s25 + $0x8] sm:$0xff]  ;;  %1593 = vmatpush.msrb.mxu2 %v1521_v40 }
 0x576   : > { %1160 = vmatpush.msra.mxu1 %v1052_v44  ;;  %1541 = vmatpush.msrb.mxu0 %v1489_v30  ;;  %v1501_v44 = vld [vmem:[%s2329_s27 + $0xd0] sm:$0xff]  ;;  %v1528_v40 = vld [vmem:[%s2329_s27 + $0x1a8] sm:$0xff] }
 0x577   : > { %1619 = vmatpush.msra.mxu3 %v1537_v41  ;;  %1594 = vmatpush.msrb.mxu2 %v1520_v45  ;;  %v1492_v45 = vld [vmem:[%s2329_s27 + $0x88] sm:$0xff] }
 0x578   : > { %1566 = vmatpush.msrb.mxu1 %v1506_v5 }
 0x579   : > { %1620 = vmatpush.msra.mxu3 %v1536_v46 }
 0x57a   : > { %1567 = vmatpush.msrb.mxu1 %v1505_v31 }
 0x57c   : > { %1568 = vmatpush.msrb.mxu1 %v1504_v32 }
 0x57e   : > { %1569 = vmatpush.msrb.mxu1 %v1503_v4  ;;  %v1477_v4 = vld [vmem:[%s2329_s27 + $0x10] sm:$0xff] }
 0x580   : > { %1570 = vmatpush.msrb.mxu1 %v1502_v38 }
 0x582   : > { %1571 = vmatpush.msrb.mxu1 %v1501_v44  ;;  %v1476_v44 = vld [vmem:[%s2329_s27 + $0x8] sm:$0xff] }
 0x5d8   : > { %v999_v47 = vpop.xlane.xlu2 %998 }
 0x5d9   : > { %v1004_v48 = vmul.f32 %v999_v47, %v2358_v18  ;;  %v1484_v47 = vld [vmem:[%s2329_s27 + $0x48] sm:$0xff] }
 0x5db   : > { %v1007_v21 = vadd.f32 1e-05, %v1004_v48  ;;  %v1500_v48 = vld [vmem:[%s2329_s27 + $0xc8] sm:$0xff] }
 0x5dc   : > { %1572 = vmatpush.msrb.mxu1 %v1500_v48  ;;  %v1511_v48 = vld [vmem:[%s2329_s27 + $0x120] sm:$0xff] }
 0x5dd   : > { %1983 = vrsqrt.f32 %v1007_v21  ;;  %vm1016_vm14 = vweird.f32 %v1007_v21 }
 0x5e0   : > { %v1001_v49 = vpop.xlane.xlu2 %1000 }
 0x5e1   : > { %v1005_v50 = vmul.f32 %v1001_v49, %v2358_v18  ;;  %v1535_v49 = vld [vmem:[%s2329_s27 + $0x1e0] sm:$0xff] }
 0x5e2   : > { %1621 = vmatpush.msra.mxu3 %v1535_v49 }
 0x5e3   : > { %v1984_v51 = vpop.eup %1983  ;;  %v1008_v52 = vadd.f32 1e-05, %v1005_v50  ;;  %v1483_v50 = vld [vmem:[%s2329_s27 + $0x40] sm:$0xff] }
 0x5e4   : > { %v1011_v53 = vmul.f32 %v1984_v51, %v1007_v21  ;;  %vm1017_vm13 = vweird.f32 %v1984_v51  ;;  %v1519_v21 = vld [vmem:[%s2329_s27 + $0x160] sm:$0xff] }
 0x5e5   : > { %1985 = vrsqrt.f32 %v1008_v52  ;;  %vm1018_vm15 = vmor %vm1016_vm14, %vm1017_vm13  ;;  %vm1026_vm1 = vweird.f32 %v1008_v52  ;;  %1595 = vmatpush.msrb.mxu2 %v1519_v21  ;;  %v1527_v21 = vld [vmem:[%s2329_s27 + $0x1a0] sm:$0xff] }
 0x5e6   : > { %v1012_v54 = vmul.f32 %v1984_v51, %v1011_v53  ;;  %v2650_v53 = vld [vmem:[%s2316_s13] sm:$0xff] }
 0x5e8   : > { %v1013_v55 = vmul.f32 0.5, %v1012_v54  ;;  %v1003_v56 = vpop.xlane.xlu2 %1002  ;;  %v2653_v54 = vperm.slane %v2650_v53, 6 }
 0x5e9   : > { %v1006_v57 = vmul.f32 %v1003_v56, %v2358_v18  ;;  %v1534_v56 = vld [vmem:[%s2329_s27 + $0x1d8] sm:$0xff] }
 0x5ea   : > { %v1014_v58 = vsub.f32 1.5, %v1013_v55  ;;  %v2656_v55 = vperm.slane %v2432_v26, 6  ;;  %1622 = vmatpush.msra.mxu3 %v1534_v56  ;;  %v427_v26 = vld [vmem:[%s2316_s13 + $0x18] sm:$0xff] }
 0x5eb   : > { %v1986_v59 = vpop.eup %1985  ;;  %v1009_v60 = vadd.f32 1e-05, %v1006_v57  ;;  %v1482_v57 = vld [vmem:[%s2329_s27 + $0x38] sm:$0xff] }
 0x5ec   : > { %v1015_v61 = vmul.f32 %v1984_v51, %v1014_v58  ;;  %v1021_v62 = vmul.f32 %v1986_v59, %v1008_v52  ;;  %vm1027_vm0 = vweird.f32 %v1986_v59  ;;  %v1518_v52 = vld [vmem:[%s2329_s27 + $0x158] sm:$0xff] }
 0x5ed   : > { %1987 = vrsqrt.f32 %v1009_v60  ;;  %vm1028_vm2 = vmor %vm1026_vm1, %vm1027_vm0  ;;  %vm1036_vm4 = vweird.f32 %v1009_v60  ;;  %1596 = vmatpush.msrb.mxu2 %v1518_v52  ;;  %v1498_v58 = vld [vmem:[%s2329_s27 + $0xb8] sm:$0xff] }
 0x5ee   : > { %v1019_v63 = vsel %vm1018_vm15, %v1984_v51, %v1015_v61  ;;  %v1022_v0 = vmul.f32 %v1986_v59, %v1021_v62  ;;  %v1499_v51 = vld [vmem:[%s2329_s27 + $0xc0] sm:$0xff] }
 0x5ef   : > { %v1040_v1 = vmul.f32 %v1019_v63, %v2544_v35  ;;  %1573 = vmatpush.msrb.mxu1 %v1499_v51  ;;  %v1491_v51 = vld [vmem:[%s2329_s27 + $0x80] sm:$0xff] }
 0x5f0   : > { %v1023_v6 = vmul.f32 0.5, %v1022_v0  ;;  %v1481_v0 = vld [vmem:[%s2329_s27 + $0x30] sm:$0xff] }
 0x5f1   : > { %v1044_v7 = vmul.f32 %v1043_v29, %v1040_v1  ;;  %1574 = vmatpush.msrb.mxu1 %v1498_v58  ;;  %v1497_v1 = vld [vmem:[%s2329_s27 + $0xb0] sm:$0xff]  ;;  %v1510_v58 = vld [vmem:[%s2329_s27 + $0x118] sm:$0xff] }
 0x5f2   : > { %v1024_v18 = vsub.f32 1.5, %v1023_v6  ;;  %v1532_v6 = vld [vmem:[%s2329_s27 + $0x1c8] sm:$0xff] }
 0x5f3   : > { %v1988_v8 = vpop.eup %1987  ;;  %v1048_v9 = vadd.f32 %v1047_v2, %v1044_v7  ;;  %1575 = vmatpush.msrb.mxu1 %v1497_v1 }
 0x5f4   : > { %v1025_v10 = vmul.f32 %v1986_v59, %v1024_v18  ;;  %v1031_v13 = vmul.f32 %v1988_v8, %v1009_v60  ;;  %vm1037_vm3 = vweird.f32 %v1988_v8  ;;  %v1533_v60 = vld [vmem:[%s2329_s27 + $0x1d0] sm:$0xff] }
 0x5f5   : > { %1135 = vmatmul.f32.vlgmr.msra.gmra.mxu0 %v1048_v9  ;;  %1161 = vmatmul.f32.vlgmr.msra.gmra.mxu1 %v1048_v9  ;;  %vm1038_vm5 = vmor %vm1036_vm4, %vm1037_vm3 }
 0x5f6   : > { %v1029_v14 = vsel %vm1028_vm2, %v1986_v59, %v1025_v10  ;;  %v1032_v15 = vmul.f32 %v1988_v8, %v1031_v13  ;;  %1187 = vmatmul.f32.vlgmr.msra.gmra.mxu2 %v1048_v9  ;;  %1213 = vmatmul.f32.vlgmr.msrb.gmra.mxu3 %v1048_v9  ;;  %v1517_v59 = vld [vmem:[%s2329_s27 + $0x150] sm:$0xff]  ;;  %v1496_v9 = vld [vmem:[%s2329_s27 + $0xa8] sm:$0xff]  ;;  %v2679_v10 = vperm.slane %v2440_v11, 6  ;;  %v2681_v13 = vperm.slane %v427_v26, 6  ;;  %v1530_v11 = vld [vmem:[%s2329_s27 + $0x1b8] sm:$0xff] }
 0x5f7   : > { %v1041_v35 = vmul.f32 %v1029_v14, %v2550_v39  ;;  %1597 = vmatpush.msrb.mxu2 %v1517_v59  ;;  %1623 = vmatpush.msra.mxu3 %v1533_v60  ;;  %v1515_v14 = vld [vmem:[%s2329_s27 + $0x140] sm:$0xff]  ;;  %v1526_v59 = vld [vmem:[%s2329_s27 + $0x198] sm:$0xff]  ;;  %v1509_v26 = vld [vmem:[%s2329_s27 + $0x110] sm:$0xff] }
 0x5f8   : > { %v1033_v16 = vmul.f32 0.5, %v1032_v15  ;;  %1576 = vmatpush.msrb.mxu1 %v1496_v9  ;;  %v1531_v15 = vld [vmem:[%s2329_s27 + $0x1c0] sm:$0xff] }
 0x5f9   : > { %v1045_v28 = vmul.f32 %v1043_v29, %v1041_v35  ;;  %1624 = vmatpush.msra.mxu3 %v1532_v6  ;;  %v1524_v6 = vld [vmem:[%s2329_s27 + $0x188] sm:$0xff]  ;;  %v1523_v9 = vld [vmem:[%s2329_s27 + $0x180] sm:$0xff] }
 0x5fa   : > { %v1034_v19 = vsub.f32 1.5, %v1033_v16 }
 0x5fb   : > { %v1049_v20 = vadd.f32 %v1047_v2, %v1045_v28  ;;  %1625 = vmatpush.msra.mxu3 %v1531_v15  ;;  %v1479_v28 = vld [vmem:[%s2329_s27 + $0x20] sm:$0xff] }
 0x5fc   : > { %v1035_v3 = vmul.f32 %v1988_v8, %v1034_v19  ;;  %v1495_v19 = vld [vmem:[%s2329_s27 + $0xa0] sm:$0xff] }
 0x5fd   : > { %1138 = vmatmul.f32.gmra.mxu0 %v1049_v20  ;;  %1164 = vmatmul.f32.gmra.mxu1 %v1049_v20 }
 0x5fe   : > { %v1039_v22 = vsel %vm1038_vm5, %v1988_v8, %v1035_v3  ;;  %1190 = vmatmul.f32.gmra.mxu2 %v1049_v20  ;;  %1216 = vmatmul.f32.gmra.mxu3 %v1049_v20  ;;  %v1480_v8 = vld [vmem:[%s2329_s27 + $0x28] sm:$0xff]  ;;  %v1514_v20 = vld [vmem:[%s2329_s27 + $0x138] sm:$0xff] }
 0x5ff   : > { %v1042_v39 = vmul.f32 %v1039_v22, %v2556_v43  ;;  %v1488_v43 = vld [vmem:[%s2329_s27 + $0x68] sm:$0xff]  ;;  %1577 = vmatpush.msrb.mxu1 %v1495_v19  ;;  %1626 = vmatpush.msra.mxu3 %v1530_v11 }
 0x600   : > { %1542 = vmatpush.msrb.mxu0 %v1488_v43  ;;  %v1529_v43 = vld [vmem:[%s2329_s27 + $0x1b0] sm:$0xff] }
 0x601   : > { %v1046_v24 = vmul.f32 %v1043_v29, %v1042_v39  ;;  %v1478_v39 = vld [vmem:[%s2329_s27 + $0x18] sm:$0xff]  ;;  %1627 = vmatpush.msra.mxu3 %v1529_v43 }
 0x602   : > { %1543 = vmatpush.msrb.mxu0 %v1487_v33 }
 0x603   : > { %v1050_v25 = vadd.f32 %v1047_v2, %v1046_v24  ;;  %v1516_v2 = vld [vmem:[%s2329_s27 + $0x148] sm:$0xff]  ;;  %v1494_v24 = vld [vmem:[%s2329_s27 + $0x98] sm:$0xff]  ;;  %1628 = vmatpush.msra.mxu3 %v1528_v40 }
 0x604   : > { %1544 = vmatpush.msrb.mxu0 %v1486_v37  ;;  %1598 = vmatpush.msrb.mxu2 %v1516_v2  ;;  %v1508_v2 = vld [vmem:[%s2329_s27 + $0x108] sm:$0xff] }
 0x605   : > { %1141 = vmatmul.f32.gmra.mxu0 %v1050_v25  ;;  %1167 = vmatmul.f32.gmra.mxu1 %v1050_v25 }
 0x606   : > { %1193 = vmatmul.f32.gmra.mxu2 %v1050_v25  ;;  %1219 = vmatmul.f32.gmra.mxu3 %v1050_v25  ;;  %v1513_v25 = vld [vmem:[%s2329_s27 + $0x130] sm:$0xff] }
 0x607   : > { %1545 = vmatpush.msrb.mxu0 %v1485_v42  ;;  %1599 = vmatpush.msrb.mxu2 %v1515_v14 }
 0x608   : > { %1578 = vmatpush.msrb.mxu1 %v1494_v24  ;;  %1629 = vmatpush.msra.mxu3 %v1527_v21 }
 0x609   : > { %1546 = vmatpush.msrb.mxu0 %v1484_v47  ;;  %1600 = vmatpush.msrb.mxu2 %v1514_v20 }
 0x60a   : > { %1579 = vmatpush.msrb.mxu1 %v1493_v34  ;;  %1630 = vmatpush.msra.mxu3 %v1526_v59 }
 0x60b   : > { %1547 = vmatpush.msrb.mxu0 %v1483_v50  ;;  %1601 = vmatpush.msrb.mxu2 %v1513_v25  ;;  %v1475_v50 = vld [vmem:[%s2329_s27] sm:$0xff] }
 0x60c   : > { %1580 = vmatpush.msrb.mxu1 %v1492_v45 }
 0x60d   : > { %1548 = vmatpush.msrb.mxu0 %v1482_v57  ;;  %1602 = vmatpush.msrb.mxu2 %v1512_v36 }
 0x60e   : > { %1581 = vmatpush.msrb.mxu1 %v1491_v51 }
 0x60f   : > { %1549 = vmatpush.msrb.mxu0 %v1481_v0  ;;  %1603 = vmatpush.msrb.mxu2 %v1511_v48  ;;  %v1525_v0 = vld [vmem:[%s2329_s27 + $0x190] sm:$0xff] }
 0x610   : > { %1631 = vmatpush.msra.mxu3 %v1525_v0 }
 0x611   : > { %1550 = vmatpush.msrb.mxu0 %v1480_v8  ;;  %1604 = vmatpush.msrb.mxu2 %v1510_v58  ;;  %v1507_v8 = vld [vmem:[%s2329_s27 + $0x100] sm:$0xff] }
 0x612   : > { %1632 = vmatpush.msra.mxu3 %v1524_v6 }
 0x613   : > { %1551 = vmatpush.msrb.mxu0 %v1479_v28  ;;  %1605 = vmatpush.msrb.mxu2 %v1509_v26 }
 0x614   : > { %1633 = vmatpush.msra.mxu3 %v1523_v9 }
 0x615   : > { %1552 = vmatpush.msrb.mxu0 %v1478_v39  ;;  %1606 = vmatpush.msrb.mxu2 %v1508_v2 }
 0x617   : > { %1553 = vmatpush.msrb.mxu0 %v1477_v4  ;;  %1607 = vmatpush.msrb.mxu2 %v1507_v8 }
 0x619   : > { %1554 = vmatpush.msrb.mxu0 %v1476_v44 }
 0x61b   : > { %1555 = vmatpush.msrb.mxu0 %v1475_v50 }
 0x672   : > { %v1136_v61 = vpop.f32.mrf.mxu0  ;;  %v1162_v62 = vpop.f32.mrf.mxu1 }
 0x673   : > { %v2665_v29 = vadd.f32 %v1136_v61, %v2653_v54  ;;  %v2668_v63 = vadd.f32 %v1162_v62, %v2656_v55 }
 0x675   : > { %v1843_v7 = vmul.f32 -1.702, %v2665_v29  ;;  %v1844_v18 = vmul.f32 -1.702, %v2668_v63 }
 0x677   : > { %v1247_v35 = vmul.f32 1.442695, %v1843_v7  ;;  %v1249_v16 = vmul.f32 1.442695, %v1844_v18 }
 0x679   : > { %1989 = vpow2.f32 %v1247_v35  ;;  %v1188_v3 = vpop.f32.mrf.mxu2  ;;  %v1214_v22 = vpop.f32.mrf.mxu3 }
 0x67a   : > { %1991 = vpow2.f32 %v1249_v16  ;;  %v2693_v27 = vadd.f32 %v1188_v3, %v2679_v10  ;;  %v2696_v5 = vadd.f32 %v1214_v22, %v2681_v13  ;;  %v1139_v30 = vpop.f32.mrf.mxu0  ;;  %v1165_v31 = vpop.f32.mrf.mxu1 }
 0x67b   : > { %v2700_v32 = vadd.f32 %v1139_v30, %v2653_v54  ;;  %v2703_v33 = vadd.f32 %v1165_v31, %v2656_v55 }
 0x67c   : > { %v1845_v37 = vmul.f32 -1.702, %v2693_v27  ;;  %v1846_v38 = vmul.f32 -1.702, %v2696_v5 }
 0x67d   : > { %v1847_v41 = vmul.f32 -1.702, %v2700_v32  ;;  %v1848_v42 = vmul.f32 -1.702, %v2703_v33 }
 0x67e   : > { %v1251_v46 = vmul.f32 1.442695, %v1845_v37  ;;  %v1253_v47 = vmul.f32 1.442695, %v1846_v38 }
 0x67f   : > { %v1990_v49 = vpop.eup %1989  ;;  %v1255_v57 = vmul.f32 1.442695, %v1847_v41  ;;  %v1257_v61 = vmul.f32 1.442695, %v1848_v42 }
 0x680   : > { %v1992_v52 = vpop.eup %1991  ;;  %v2719_v56 = vadd.f32 1.0, %v1990_v49  ;;  %1993 = vpow2.f32 %v1251_v46 }
 0x681   : > { %v2723_v60 = vadd.f32 1.0, %v1992_v52  ;;  %1995 = vpow2.f32 %v1253_v47  ;;  %v1191_v62 = vpop.f32.mrf.mxu2  ;;  %v1217_v1 = vpop.f32.mrf.mxu3 }
 0x682   : > { %1997 = vrcp.f32 %v2719_v56  ;;  %v2732_v7 = vadd.f32 %v1191_v62, %v2679_v10  ;;  %v1142_v18 = vpop.f32.mrf.mxu0  ;;  %v1292_v14 = vand.u32 2147483647, %v2719_v56  ;;  %v1294_v15 = vand.u32 2147483648, %v2719_v56  ;;  %v1168_v25 = vpop.f32.mrf.mxu1 }
 0x683   : > { %1999 = vrcp.f32 %v2723_v60  ;;  %v1309_v35 = vand.u32 2147483648, %v2723_v60  ;;  %v1307_v28 = vand.u32 2147483647, %v2723_v60  ;;  %v2742_v20 = vadd.f32 %v1217_v1, %v2681_v13 }
 0x684   : > { %2001 = vpow2.f32 %v1255_v57  ;;  %v1849_v19 = vmul.f32 -1.702, %v2732_v7  ;;  %v2747_v22 = vadd.f32 %v1142_v18, %v2653_v54  ;;  %vm1288_vm6 = vweird.f32 %v2719_v56 }
 0x685   : > { %2003 = vpow2.f32 %v1257_v61  ;;  %vm1303_vm7 = vweird.f32 %v2723_v60  ;;  %vm2754_vm8 = vcmp.eq.f32.partialorder %v1292_v14, 8.507059e+37  ;;  %v1295_v4 = vor.u32 1.1754944e-38, %v1294_v15 }
 0x686   : > { %v1994_v16 = vpop.eup %1993  ;;  %v1310_v54 = vor.u32 1.1754944e-38, %v1309_v35  ;;  %vm2760_vm9 = vcmp.eq.f32.partialorder %v1307_v28, 8.507059e+37  ;;  %v1259_v40 = vmul.f32 1.442695, %v1849_v19  ;;  %v1850_v41 = vmul.f32 -1.702, %v2742_v20 }
 0x687   : > { %v1996_v11 = vpop.eup %1995  ;;  %v2744_v3 = vadd.f32 1.0, %v1994_v16  ;;  %v1851_v45 = vmul.f32 -1.702, %v2747_v22  ;;  %v2769_v46 = vadd.f32 %v1168_v25, %v2656_v55 }
 0x688   : > { %v1998_v39 = vpop.eup %1997  ;;  %v2751_v24 = vadd.f32 1.0, %v1996_v11  ;;  %v1261_v58 = vmul.f32 1.442695, %v1850_v41 }
 0x689   : > { %v2000_v30 = vpop.eup %1999  ;;  %v1284_v31 = vmul.f32 %v1998_v39, %v2719_v56  ;;  %2005 = vrcp.f32 %v2744_v3  ;;  %v1324_v38 = vand.u32 2147483648, %v2744_v3  ;;  %vm1289_vm10 = vweird.f32 %v1998_v39  ;;  %v1194_v55 = vpop.f32.mrf.mxu2 }
 0x68a   : > { %v2002_v34 = vpop.eup %2001  ;;  %v1299_v36 = vmul.f32 %v2000_v30, %v2723_v60  ;;  %2007 = vrcp.f32 %v2751_v24  ;;  %vm1304_vm11 = vweird.f32 %v2000_v30  ;;  %v1322_v48 = vand.u32 2147483647, %v2744_v3  ;;  %vm1290_vm13 = vmor %vm1288_vm6, %vm1289_vm10  ;;  %v1220_v19 = vpop.f32.mrf.mxu3 }
 0x68b   : > { %v2004_v42 = vpop.eup %2003  ;;  %v1285_v44 = vsub.f32 1.0, %v1284_v31  ;;  %v1337_v49 = vand.u32 2147483647, %v2751_v24  ;;  %v2773_v50 = vadd.f32 1.0, %v2002_v34  ;;  %vm1318_vm12 = vweird.f32 %v2744_v3  ;;  %vm1305_vm0 = vmor %vm1303_vm7, %vm1304_vm11 }
 0x68c   : > { %v1300_v47 = vsub.f32 1.0, %v1299_v36  ;;  %v2775_v51 = vadd.f32 1.0, %v2004_v42  ;;  %v1325_v57 = vor.u32 1.1754944e-38, %v1324_v38  ;;  %2009 = vpow2.f32 %v1259_v40 }
 0x68d   : > { %v1286_v21 = vmul.f32 %v1998_v39, %v1285_v44  ;;  %2011 = vrcp.f32 %v2773_v50  ;;  %v1263_v62 = vmul.f32 1.442695, %v1851_v45  ;;  %v1852_v26 = vmul.f32 -1.702, %v2769_v46 }
 0x68e   : > { %v1301_v52 = vmul.f32 %v2000_v30, %v1300_v47  ;;  %vm2784_vm14 = vcmp.eq.f32.partialorder %v1322_v48, 8.507059e+37  ;;  %vm1333_vm15 = vweird.f32 %v2751_v24  ;;  %v1339_v6 = vand.u32 2147483648, %v2751_v24 }
 0x68f   : > { %v2006_v59 = vpop.eup %2005  ;;  %v1287_v61 = vadd.f32 %v1998_v39, %v1286_v21  ;;  %2013 = vrcp.f32 %v2775_v51  ;;  %v1265_v56 = vmul.f32 1.442695, %v1852_v26  ;;  %v2795_v9 = vadd.f32 %v1194_v55, %v2679_v10 }
 0x690   : > { %v1302_v0 = vadd.f32 %v2000_v30, %v1301_v52  ;;  %v1314_v1 = vmul.f32 %v2006_v59, %v2744_v3  ;;  %v2008_v18 = vpop.eup %2007  ;;  %2015 = vpow2.f32 %v1261_v58  ;;  %vm2800_vm1 = vcmp.eq.f32.partialorder %v1337_v49, 8.507059e+37 }
 0x691   : > { %v1291_v8 = vsel %vm1290_vm13, %v1998_v39, %v1287_v61  ;;  %v1329_v16 = vmul.f32 %v2008_v18, %v2751_v24  ;;  %vm1319_vm2 = vweird.f32 %v2006_v59  ;;  %2017 = vpow2.f32 %v1263_v62 }
 0x692   : > { %v1296_v14 = vsel %vm2754_vm8, %v1295_v4, %v1291_v8  ;;  %v1306_v15 = vsel %vm1305_vm0, %v2000_v30, %v1302_v0  ;;  %v1315_v35 = vsub.f32 1.0, %v1314_v1  ;;  %v2010_v10 = vpop.eup %2009  ;;  %2019 = vpow2.f32 %v1265_v56  ;;  %vm1320_vm4 = vmor %vm1318_vm12, %vm1319_vm2 }
 0x693   : > { %v1463_v60 = vmul.f32 %v1296_v14, %v2665_v29  ;;  %v1311_v11 = vsel %vm2760_vm9, %v1310_v54, %v1306_v15  ;;  %v1330_v30 = vsub.f32 1.0, %v1329_v16  ;;  %v2012_v31 = vpop.eup %2011  ;;  %v1340_v43 = vor.u32 1.1754944e-38, %v1339_v6 }
 0x694   : > { %v1464_v39 = vmul.f32 %v1311_v11, %v2668_v63  ;;  %v1316_v25 = vmul.f32 %v2006_v59, %v1315_v35  ;;  %v2808_v4 = vadd.f32 1.0, %v2010_v10  ;;  %v1853_v34 = vmul.f32 -1.702, %v2795_v9 }
 0x695   : > { %v2812_v36 = vadd.f32 %v1220_v19, %v2681_v13  ;;  %1556 = vmatmul.f32.vlgmr.msrb.gmra.mxu0 %v1463_v60  ;;  %v2814_v29 = vpop.eup %2013  ;;  %v1331_v37 = vmul.f32 %v2008_v18, %v1330_v30  ;;  %vm1334_vm3 = vweird.f32 %v2008_v18  ;;  %v1344_v63 = vmul.f32 %v2012_v31, %v2773_v50 }
 0x696   : > { %v1317_v54 = vadd.f32 %v2006_v59, %v1316_v25  ;;  %1582 = vmatmul.f32.vlgmr.msrb.gmra.mxu1 %v1464_v39  ;;  %v2016_v38 = vpop.eup %2015  ;;  %2021 = vrcp.f32 %v2808_v4  ;;  %v1267_v40 = vmul.f32 1.442695, %v1853_v34  ;;  %vm1349_vm5 = vweird.f32 %v2012_v31  ;;  %vm1335_vm6 = vmor %vm1333_vm15, %vm1334_vm3 }
 0x697   : > { %v1854_v13 = vmul.f32 -1.702, %v2812_v36  ;;  %v1332_v42 = vadd.f32 %v2008_v18, %v1331_v37  ;;  %v2822_v44 = vadd.f32 1.0, %v2016_v38  ;;  %v1345_v45 = vsub.f32 1.0, %v1344_v63  ;;  %v2018_v47 = vpop.eup %2017 }
 0x698   : > { %v1321_v41 = vsel %vm1320_vm4, %v2006_v59, %v1317_v54  ;;  %2023 = vpow2.f32 %v1267_v40  ;;  %v1352_v21 = vand.u32 2147483647, %v2773_v50  ;;  %v2020_v49 = vpop.eup %2019  ;;  %v2832_v55 = vadd.f32 1.0, %v2018_v47 }
 0x699   : > { %v1326_v48 = vsel %vm2784_vm14, %v1325_v57, %v1321_v41  ;;  %v1269_v3 = vmul.f32 1.442695, %v1854_v13  ;;  %v1336_v58 = vsel %vm1335_vm6, %v2008_v18, %v1332_v42  ;;  %2025 = vrcp.f32 %v2822_v44 }
 0x69a   : > { %v1465_v52 = vmul.f32 %v1326_v48, %v2693_v27  ;;  %v1341_v59 = vsel %vm2800_vm1, %v1340_v43, %v1336_v58  ;;  %v2836_v57 = vadd.f32 1.0, %v2020_v49  ;;  %v1346_v24 = vmul.f32 %v2012_v31, %v1345_v45 }
 0x69b   : > { %2027 = vpow2.f32 %v1269_v3  ;;  %v1466_v61 = vmul.f32 %v1341_v59, %v2696_v5  ;;  %v1354_v62 = vand.u32 2147483648, %v2773_v50  ;;  %v1359_v27 = vmul.f32 %v2814_v29, %v2775_v51 }
 0x69c   : > { %1608 = vmatmul.f32.vlgmr.msrb.gmra.mxu2 %v1465_v52  ;;  %v2022_v26 = vpop.eup %2021  ;;  %2029 = vrcp.f32 %v2832_v55  ;;  %v1347_v0 = vadd.f32 %v2012_v31, %v1346_v24  ;;  %vm1348_vm7 = vweird.f32 %v2773_v50  ;;  %vm1353_vm8 = vcmp.eq.f32.partialorder %v1352_v21, 8.507059e+37 }
 0x69d   : > { %2031 = vrcp.f32 %v2836_v57  ;;  %1634 = vmatmul.f32.vlgmr.msra.gmra.mxu3 %v1466_v61  ;;  %vm1350_vm9 = vmor %vm1348_vm7, %vm1349_vm5  ;;  %v1355_v1 = vor.u32 1.1754944e-38, %v1354_v62  ;;  %v1360_v5 = vsub.f32 1.0, %v1359_v27  ;;  %v1369_v2 = vand.u32 2147483648, %v2775_v51 }
 0x69e   : > { %v2024_v6 = vpop.eup %2023  ;;  %v1351_v18 = vsel %vm1350_vm9, %v2012_v31, %v1347_v0  ;;  %vm1363_vm10 = vweird.f32 %v2775_v51  ;;  %vm1364_vm11 = vweird.f32 %v2814_v29  ;;  %v1374_v8 = vmul.f32 %v2022_v26, %v2808_v4 }
 0x69f   : > { %v2026_v56 = vpop.eup %2025  ;;  %v2850_v50 = vadd.f32 1.0, %v2024_v6  ;;  %v1356_v14 = vsel %vm1353_vm8, %v1355_v1, %v1351_v18  ;;  %v1361_v15 = vmul.f32 %v2814_v29, %v1360_v5  ;;  %v1367_v35 = vand.u32 2147483647, %v2775_v51  ;;  %vm1365_vm14 = vmor %vm1363_vm10, %vm1364_vm11 }
 0x6a0   : > { %v1467_v28 = vmul.f32 %v1356_v14, %v2700_v32  ;;  %v1375_v19 = vsub.f32 1.0, %v1374_v8  ;;  %vm1378_vm12 = vweird.f32 %v2808_v4  ;;  %v1382_v60 = vand.u32 2147483647, %v2808_v4 }
 0x6a1   : > { %v2028_v16 = vpop.eup %2027  ;;  %v1362_v11 = vadd.f32 %v2814_v29, %v1361_v15  ;;  %v1370_v10 = vor.u32 1.1754944e-38, %v1369_v2  ;;  %vm1379_vm13 = vweird.f32 %v2022_v26  ;;  %v1384_v39 = vand.u32 2147483648, %v2808_v4 }
 0x6a2   : > { %v2030_v25 = vpop.eup %2029  ;;  %2033 = vrcp.f32 %v2850_v50  ;;  %v2860_v30 = vadd.f32 1.0, %v2028_v16  ;;  %1559 = vmatmul.f32.gmra.mxu0 %v1467_v28  ;;  %v1376_v32 = vmul.f32 %v2022_v26, %v1375_v19  ;;  %v1389_v31 = vmul.f32 %v2026_v56, %v2822_v44  ;;  %vm1380_vm2 = vmor %vm1378_vm12, %vm1379_vm13 }
 0x6a3   : > { %v2867_v43 = vpop.eup %2031  ;;  %v1366_v34 = vsel %vm1365_vm14, %v2814_v29, %v1362_v11  ;;  %vm1368_vm15 = vcmp.eq.f32.partialorder %v1367_v35, 8.507059e+37  ;;  %vm2870_vm0 = vcmp.eq.f32.partialorder %v1382_v60, 8.507059e+37  ;;  %vm1393_vm1 = vweird.f32 %v2822_v44 }
 0x6a4   : > { %v1371_v37 = vsel %vm1368_vm15, %v1370_v10, %v1366_v34  ;;  %v1377_v63 = vadd.f32 %v2022_v26, %v1376_v32  ;;  %v1385_v38 = vor.u32 1.1754944e-38, %v1384_v39  ;;  %v1390_v40 = vsub.f32 1.0, %v1389_v31 }
 0x6a5   : > { %v1468_v51 = vmul.f32 %v1371_v37, %v2703_v33  ;;  %v1397_v13 = vand.u32 2147483647, %v2822_v44  ;;  %v1399_v29 = vand.u32 2147483648, %v2822_v44  ;;  %v1404_v41 = vmul.f32 %v2030_v25, %v2832_v55 }
 0x6a6   : > { %2035 = vrcp.f32 %v2860_v30  ;;  %v1381_v42 = vsel %vm1380_vm2, %v2022_v26, %v1377_v63  ;;  %v1391_v45 = vmul.f32 %v2026_v56, %v1390_v40  ;;  %vm1394_vm3 = vweird.f32 %v2026_v56 }
 0x6a7   : > { %1585 = vmatmul.f32.gmra.mxu1 %v1468_v51  ;;  %v1386_v47 = vsel %vm2870_vm0, %v1385_v38, %v1381_v42  ;;  %v1405_v33 = vsub.f32 1.0, %v1404_v41  ;;  %vm1408_vm4 = vweird.f32 %v2832_v55  ;;  %v1412_v4 = vand.u32 2147483647, %v2832_v55  ;;  %vm1395_vm5 = vmor %vm1393_vm1, %vm1394_vm3 }
 0x6a8   : > { %v2034_v48 = vpop.eup %2033  ;;  %v1469_v3 = vmul.f32 %v1386_v47, %v2732_v7  ;;  %v1392_v21 = vadd.f32 %v2026_v56, %v1391_v45  ;;  %v1414_v49 = vand.u32 2147483648, %v2832_v55  ;;  %v1419_v52 = vmul.f32 %v2867_v43, %v2836_v57 }
 0x6a9   : > { %vm1398_vm6 = vcmp.eq.f32.partialorder %v1397_v13, 8.507059e+37  ;;  %v1400_v58 = vor.u32 1.1754944e-38, %v1399_v29  ;;  %v1406_v59 = vmul.f32 %v2030_v25, %v1405_v33  ;;  %vm1409_vm7 = vweird.f32 %v2030_v25 }
 0x6aa   : > { %1611 = vmatmul.f32.gmra.mxu2 %v1469_v3  ;;  %v1396_v24 = vsel %vm1395_vm5, %v2026_v56, %v1392_v21  ;;  %vm2893_vm8 = vcmp.eq.f32.partialorder %v1412_v4, 8.507059e+37  ;;  %v1420_v7 = vsub.f32 1.0, %v1419_v52  ;;  %vm1424_vm9 = vweird.f32 %v2867_v43  ;;  %vm1410_vm10 = vmor %vm1408_vm4, %vm1409_vm7 }
 0x6ab   : > { %v1401_v62 = vsel %vm1398_vm6, %v1400_v58, %v1396_v24  ;;  %v1407_v27 = vadd.f32 %v2030_v25, %v1406_v59  ;;  %v1429_v26 = vand.u32 2147483648, %v2836_v57  ;;  %v1434_v44 = vmul.f32 %v2034_v48, %v2850_v50 }
 0x6ac   : > { %v2036_v0 = vpop.eup %2035  ;;  %v1470_v1 = vmul.f32 %v1401_v62, %v2742_v20  ;;  %v1415_v5 = vor.u32 1.1754944e-38, %v1414_v49  ;;  %v1421_v2 = vmul.f32 %v2867_v43, %v1420_v7  ;;  %v1427_v6 = vand.u32 2147483647, %v2836_v57 }
 0x6ad   : > { %v1411_v18 = vsel %vm1410_vm10, %v2030_v25, %v1407_v27  ;;  %vm1423_vm11 = vweird.f32 %v2836_v57  ;;  %v1430_v8 = vor.u32 1.1754944e-38, %v1429_v26  ;;  %v1435_v56 = vsub.f32 1.0, %v1434_v44 }
 0x6ae   : > { %1637 = vmatmul.f32.gmra.mxu3 %v1470_v1  ;;  %v1416_v14 = vsel %vm2893_vm8, %v1415_v5, %v1411_v18  ;;  %v1422_v15 = vadd.f32 %v2867_v43, %v1421_v2  ;;  %v1442_v20 = vand.u32 2147483647, %v2850_v50  ;;  %v1444_v55 = vand.u32 2147483648, %v2850_v50  ;;  %vm1425_vm12 = vmor %vm1423_vm11, %vm1424_vm9 }
 0x6af   : > { %v1471_v35 = vmul.f32 %v1416_v14, %v2747_v22  ;;  %v1436_v16 = vmul.f32 %v2034_v48, %v1435_v56  ;;  %vm1439_vm13 = vweird.f32 %v2034_v48  ;;  %v1449_v57 = vmul.f32 %v2036_v0, %v2860_v30 }
 0x6b0   : > { %v1426_v28 = vsel %vm1425_vm12, %v2867_v43, %v1422_v15  ;;  %vm1428_vm14 = vcmp.eq.f32.partialorder %v1427_v6, 8.507059e+37  ;;  %vm1438_vm15 = vweird.f32 %v2850_v50  ;;  %vm1443_vm1 = vcmp.eq.f32.partialorder %v1442_v20, 8.507059e+37 }
 0x6b1   : > { %1562 = vmatmul.f32.gmra.mxu0 %v1471_v35  ;;  %v1431_v19 = vsel %vm1428_vm14, %v1430_v8, %v1426_v28  ;;  %v1437_v60 = vadd.f32 %v2034_v48, %v1436_v16  ;;  %v1450_v11 = vsub.f32 1.0, %v1449_v57  ;;  %vm1440_vm0 = vmor %vm1438_vm15, %vm1439_vm13  ;;  %v1445_v22 = vor.u32 1.1754944e-38, %v1444_v55 }
 0x6b2   : > { %v1472_v10 = vmul.f32 %v1431_v19, %v2769_v46  ;;  %v1459_v39 = vand.u32 2147483648, %v2860_v30  ;;  %vm1454_vm2 = vweird.f32 %v2036_v0  ;;  %v1457_v31 = vand.u32 2147483647, %v2860_v30 }
 0x6b3   : > { %v1441_v25 = vsel %vm1440_vm0, %v2034_v48, %v1437_v60  ;;  %v1451_v32 = vmul.f32 %v2036_v0, %v1450_v11  ;;  %vm1453_vm3 = vweird.f32 %v2860_v30  ;;  %v1539_v38 = vperm.slane %v2650_v53, 7 }
 0x6b4   : > { %1588 = vmatmul.f32.gmra.mxu1 %v1472_v10  ;;  %v1446_v43 = vsel %vm1443_vm1, %v1445_v22, %v1441_v25  ;;  %vm1455_vm4 = vmor %vm1453_vm3, %vm1454_vm2  ;;  %v1460_v50 = vor.u32 1.1754944e-38, %v1459_v39  ;;  %vm1458_vm5 = vcmp.eq.f32.partialorder %v1457_v31, 8.507059e+37 }
 0x6b5   : > { %v1473_v34 = vmul.f32 %v1446_v43, %v2795_v9  ;;  %v1452_v54 = vadd.f32 %v2036_v0, %v1451_v32 }
 0x6b7   : > { %1614 = vmatmul.f32.gmra.mxu2 %v1473_v34  ;;  %v1456_v46 = vsel %vm1455_vm4, %v2036_v0, %v1452_v54 }
 0x6b8   : > { %v1461_v37 = vsel %vm1458_vm5, %v1460_v50, %v1456_v46 }
 0x6b9   : > { %v1474_v63 = vmul.f32 %v1461_v37, %v2812_v36 }
 0x6bb   : > { %1640 = vmatmul.f32.gmra.mxu3 %v1474_v63 }
 0x712   : > { %v1557_v40 = vpop.f32.mrf.mxu0 }
 0x713   : > { %v1558_v51 = vadd.f32 %v1557_v40, %v1539_v38  ;;  %v1583_v13 = vpop.f32.mrf.mxu1 }
 0x715   : > { %v1584_v29 = vadd.f32 %v1583_v13, %v1558_v51 }
 0x71f   : > { %v1609_v9 = vpop.f32.mrf.mxu2  ;;  %v1560_v47 = vpop.f32.mrf.mxu0 }
 0x720   : > { %v1610_v41 = vadd.f32 %v1609_v9, %v1584_v29  ;;  %v1635_v30 = vpop.f32.mrf.mxu3  ;;  %v1561_v33 = vadd.f32 %v1560_v47, %v1539_v38 }
 0x722   : > { %v1636_v42 = vadd.f32 %v1635_v30, %v1610_v41 }
 0x724   : > { %v1644_v45 = vadd.f32 %v1636_v42, %v2523_v12  ;;  %v1586_v4 = vpop.f32.mrf.mxu1 }
 0x725   : > { %v1587_v48 = vadd.f32 %v1586_v4, %v1561_v33 }
 0x726   : > { %1647 = vst [vmem:[%s2334_s10] sm:$0xff] %v1644_v45 }
 0x72d   : > { %v1612_v36 = vpop.f32.mrf.mxu2 }
 0x72e   : > { %v1613_v3 = vadd.f32 %v1612_v36, %v1587_v48  ;;  %v1563_v21 = vpop.f32.mrf.mxu0 }
 0x72f   : > { %v1564_v58 = vadd.f32 %v1563_v21, %v1539_v38 }
 0x731   : > { %v1638_v53 = vpop.f32.mrf.mxu3  ;;  %v1589_v59 = vpop.f32.mrf.mxu1 }
 0x732   : > { %v1639_v49 = vadd.f32 %v1638_v53, %v1613_v3  ;;  %v1590_v24 = vadd.f32 %v1589_v59, %v1564_v58 }
 0x734   : > { %v1645_v52 = vadd.f32 %v1639_v49, %v2527_v17 }
 0x736   : > { %1648 = vst [vmem:[%s2334_s10 + $0x8] sm:$0xff] %v1645_v52 }
 0x73a   : > { %v1615_v61 = vpop.f32.mrf.mxu2 }
 0x73b   : > { %v1616_v7 = vadd.f32 %v1615_v61, %v1590_v24 }
 0x73e   : > { %v1641_v12 = vpop.f32.mrf.mxu3 }
 0x73f   : > { %v1642_v62 = vadd.f32 %v1641_v12, %v1616_v7 }
 0x741   : > { %v1646_v27 = vadd.f32 %v1642_v62, %v2531_v23 }
 0x743   : > { %1649 = vst [vmem:[%s2334_s10 + $0x10] sm:$0xff] %v1646_v27 }
 0x744 PF: > { %s22_s28 = sadd.s32 1, %s2168_s28   ;;  %s2983_s7 = sld [smem:[#allocation11_spill]] }
 0x745   : > { %p19_p3 = scmp.ge.s32.totalorder %s22_s28, 6   ;;  %s2984_s25 = sld [smem:[#allocation8_spill]] }
 0x746   : > { %s2985_s11 = sld [smem:[#allocation9_spill]]  ;;  %s2987_s21 = smov %s2144_s22 }
 0x747   : > { %s2986_s27 = sld [smem:[#allocation10_spill]]  ;;  %s2988_s22 = smov %s2148_s23 }
 0x748   : > { %s2990_s24 = smov %s2160_s26  ;;  %21 = sbr.rel (!%p19_p3) target bundleno = 9 (0x9), region = 113 }
 0x74a   : > { %s2989_s23 = smov %s2983_s7 }
 0x74c   : > { %s2991_s26 = smov %s2985_s11 }
 0x74d   :  { %1672 = vsyncpa [#allocation3], 1 }
 0x74e   :  { %1674 = vsyncpa [#allocation3 + $0x1], 1 }
 0x74f   :  { %1675 = vsyncpa [#allocation5], 1 }
 0x750   :  { %1677 = vsyncpa [#allocation5 + $0x1], 1 }

</bundles_post_ra>
